<compile_context>
chip_gen: v5e
topology: v5e:2x2
jax: 0.10.0
libtpu: 0.0.40
codegen_flags: <defaults>
</compile_context>

<pallas_src>
import math
from functools import partial

import jax
import jax.numpy as jnp
from jax.experimental import pallas as pl
from jax.experimental.pallas import tpu as pltpu


# ------------------------- hardware-aware defaults -------------------------

def _is_v7x():
    try:
        return "7" in jax.devices()[0].device_kind
    except Exception:
        return False


_V7X = _is_v7x()
_ROW_TILE = 256 if _V7X else 512          # row tile of the linear kernels
_REL_TILE = 128                           # (i, j) tile of the selection kernel
_VMEM_LIMIT = (40 << 20) if _V7X else (64 << 20)   # v7x has 64 MiB VMEM per core


def _cparams(sem):
    return pltpu.CompilerParams(dimension_semantics=sem,
                                vmem_limit_bytes=_VMEM_LIMIT)


def _pad_rows(x, axis, mult):
    pad = (-x.shape[axis]) % mult
    if pad == 0:
        return x
    widths = [(0, 0)] * x.ndim
    widths[axis] = (0, pad)
    return jnp.pad(x, widths)


# ------------------- fused linear (+ bias [+ tanh]) kernel -------------------

def _linear_kernel(x_ref, w_ref, b_ref, o_ref, *, apply_tanh):
    y = jnp.dot(x_ref[...], w_ref[...], preferred_element_type=jnp.float32)
    y = y + b_ref[...]
    if apply_tanh:
        y = jnp.tanh(y)
    o_ref[...] = y


def linear_pallas(x, w, b, apply_tanh=False):
    """y = x @ w + b [tanh], row-tiled on the MXU (bf16 operands, f32 accumulation)."""
    N, D = x.shape
    K = w.shape[1]
    tn = N if N <= _ROW_TILE else _ROW_TILE
    x_p = _pad_rows(x.astype(jnp.bfloat16), 0, tn)
    Np = x_p.shape[0]
    out = pl.pallas_call(
        partial(_linear_kernel, apply_tanh=apply_tanh),
        out_shape=jax.ShapeDtypeStruct((Np, K), jnp.float32),
        grid_spec=pltpu.PrefetchScalarGridSpec(
            num_scalar_prefetch=0,
            grid=(Np // tn,),
            in_specs=[
                pl.BlockSpec((tn, D), lambda r: (r, 0)),
                pl.BlockSpec((D, K), lambda r: (0, 0)),
                pl.BlockSpec((1, K), lambda r: (0, 0)),
            ],
            out_specs=pl.BlockSpec((tn, K), lambda r: (r, 0)),
        ),
        compiler_params=_cparams(("parallel",)),
    )(x_p, w.astype(jnp.bfloat16), b.reshape(1, K).astype(jnp.float32))
    return out[:N]


# ------------- fused modality head: linear + masked CE reduction -------------

def _mod_ce_kernel(x_ref, w_ref, b_ref, gold_ref, mask_ref, o_ref):
    @pl.when(pl.program_id(0) == 0)
    def _():
        o_ref[...] = jnp.zeros_like(o_ref)

    logits = jnp.dot(x_ref[...], w_ref[...], preferred_element_type=jnp.float32)
    logits = logits + b_ref[...]                        # (TN, K) f32
    gold = gold_ref[...]                                # (TN, 1) int32
    m = mask_ref[...]                                   # (TN, 1) f32
    mx = jnp.max(logits, axis=1, keepdims=True)
    lse = mx + jnp.log(jnp.sum(jnp.exp(logits - mx), axis=1, keepdims=True))
    ids = jax.lax.broadcasted_iota(jnp.int32, logits.shape, 1)
    gold_logit = jnp.sum(jnp.where(ids == gold, logits, 0.0), axis=1, keepdims=True)
    o_ref[...] = o_ref[...] + jnp.sum((lse - gold_logit) * m)


def masked_ce_sum_pallas(x, w, b, gold, mask_f):
    """sum over tokens of mask * CE(x @ w + b, gold); logits stay in VMEM."""
    N, D = x.shape
    K = w.shape[1]
    tn = N if N <= _ROW_TILE else _ROW_TILE
    x_p = _pad_rows(x.astype(jnp.bfloat16), 0, tn)
    gold_p = _pad_rows(gold.reshape(N, 1).astype(jnp.int32), 0, tn)
    mask_p = _pad_rows(mask_f.reshape(N, 1).astype(jnp.float32), 0, tn)
    Np = x_p.shape[0]
    out = pl.pallas_call(
        _mod_ce_kernel,
        out_shape=jax.ShapeDtypeStruct((1, 128), jnp.float32),
        grid_spec=pltpu.PrefetchScalarGridSpec(
            num_scalar_prefetch=0,
            grid=(Np // tn,),
            in_specs=[
                pl.BlockSpec((tn, D), lambda r: (r, 0)),
                pl.BlockSpec((D, K), lambda r: (0, 0)),
                pl.BlockSpec((1, K), lambda r: (0, 0)),
                pl.BlockSpec((tn, 1), lambda r: (r, 0)),
                pl.BlockSpec((tn, 1), lambda r: (r, 0)),
            ],
            out_specs=pl.BlockSpec((1, 128), lambda r: (0, 0)),
        ),
        compiler_params=_cparams(("arbitrary",)),
    )(x_p, w.astype(jnp.bfloat16), b.reshape(1, K).astype(jnp.float32),
      gold_p, mask_p)
    return out[0, 0]


# ------------- multi-head selection + masked BCE (tiled over b,i,j) -------------

def _rel_bce_kernel(u_ref, vt_ref, w_ref, gold_ref, mrow_ref, mcol_ref, o_ref):
    i = pl.program_id(1)
    j = pl.program_id(2)

    @pl.when(jnp.logical_and(i == 0, j == 0))
    def _():
        o_ref[...] = jnp.zeros_like(o_ref)

    u = u_ref[0]                                    # (TI, R)  f32
    vt = vt_ref[0]                                  # (R, TJ)  f32  (v pre-transposed)
    gold = gold_ref[0].astype(jnp.float32)          # (TI, K, TJ)  bf16 -> f32
    pm = mrow_ref[0] * mcol_ref[0]                  # (TI,1)*(1,TJ) -> (TI, TJ)

    ti, n_r = u.shape
    tj = vt.shape[1]
    n_rel = gold.shape[1]

    # tanh(u_i + v_j) planes are built lane-dense over j; the tiny (R x K) rel_h2o
    # weight (SMEM scalars) is contracted by scalar-weighted accumulation, VPU work
    # that hides under the EUP-bound tanh/BCE, so gold keeps its native [S,K_rel,S]
    # lane-dense layout (no K-last padding, no host transpose).
    # TODO(synk): for large rel_emb_size replace the unrolled r-loop with an MXU dot.
    acc = [jnp.zeros((ti, tj), jnp.float32) for _ in range(n_rel)]
    for r in range(n_r):
        plane = jnp.tanh(u[:, r:r + 1] + vt[r:r + 1, :])        # (TI, TJ)
        for k in range(n_rel):
            acc[k] = acc[k] + w_ref[r, k] * plane

    tile_sum = jnp.zeros((), jnp.float32)
    for k in range(n_rel):
        logits = acc[k]
        g = gold[:, k, :]                                       # (TI, TJ)
        bce = (jnp.maximum(logits, 0.0) - logits * g
               + jnp.log1p(jnp.exp(-jnp.abs(logits))))          # stable BCE-with-logits
        tile_sum = tile_sum + jnp.sum(bce * pm)

    o_ref[...] = o_ref[...] + tile_sum


def rel_bce_sum_pallas(u, vT, w, gold, mask_f):
    """Masked multi-head-selection BCE sum, tiled over (batch, i-tile, j-tile).

    u: [B,S,R], vT: [B,R,S], w: [R,K], gold: [B,S,K,S] (native module layout),
    mask_f: [B,S] float.  Emits per-batch partial sums -> batch axis is "parallel".
    """
    B, S, R = u.shape
    K = w.shape[1]
    t = S if S <= _REL_TILE else _REL_TILE
    if S % t:
        u = _pad_rows(u, 1, t)
        vT = _pad_rows(vT, 2, t)
        gold = _pad_rows(_pad_rows(gold, 1, t), 3, t)
        mask_f = _pad_rows(mask_f, 1, t)        # padded rows/cols masked out
    Sp = u.shape[1]
    nI = Sp // t
    mrow = mask_f[:, :, None]                   # (B, Sp, 1)
    mcol = mask_f[:, None, :]                   # (B, 1, Sp)
    out = pl.pallas_call(
        _rel_bce_kernel,
        out_shape=jax.ShapeDtypeStruct((B, 1, 128), jnp.float32),
        grid_spec=pltpu.PrefetchScalarGridSpec(
            num_scalar_prefetch=0,
            grid=(B, nI, nI),
            in_specs=[
                pl.BlockSpec((1, t, R), lambda b, i, j: (b, i, 0)),        # u rows
                pl.BlockSpec((1, R, t), lambda b, i, j: (b, 0, j)),        # v cols
                pl.BlockSpec(memory_space=pltpu.MemorySpace.SMEM),         # rel_h2o w
                pl.BlockSpec((1, t, K, t), lambda b, i, j: (b, i, 0, j)),  # gold native
                pl.BlockSpec((1, t, 1), lambda b, i, j: (b, i, 0)),        # mask rows
                pl.BlockSpec((1, 1, t), lambda b, i, j: (b, 0, j)),        # mask cols
            ],
            out_specs=pl.BlockSpec((1, 1, 128), lambda b, i, j: (b, 0, 0)),
        ),
        compiler_params=_cparams(("parallel", "arbitrary", "arbitrary")),
    )(u, vT, w.astype(jnp.float32), gold.astype(jnp.bfloat16), mrow, mcol)
    return jnp.sum(out[:, 0, 0])


# ------------------------- plain-JAX pieces -------------------------

def crf_nll_token_mean(emissions, tags, mask, start_t, end_t, trans):
    """-CRF log-likelihood, reduction='token_mean' (torchcrf semantics)."""
    # TODO(synk): torchcrf's forward algorithm is a tiny sequential DP; kept in plain
    # JAX (lax.fori_loop) rather than Pallas.
    B, S, K = emissions.shape
    mask_f = mask.astype(jnp.float32)

    first_tags = tags[:, 0]
    score = start_t[first_tags] + jnp.take_along_axis(
        emissions[:, 0], first_tags[:, None], axis=1)[:, 0]

    def num_step(i, score):
        prev = jax.lax.dynamic_index_in_dim(tags, i - 1, axis=1, keepdims=False)
        cur = jax.lax.dynamic_index_in_dim(tags, i, axis=1, keepdims=False)
        em_i = jax.lax.dynamic_index_in_dim(emissions, i, axis=1, keepdims=False)
        tr = trans[prev, cur]
        em = jnp.take_along_axis(em_i, cur[:, None], axis=1)[:, 0]
        m_i = jax.lax.dynamic_index_in_dim(mask_f, i, axis=1, keepdims=False)
        return score + (tr + em) * m_i

    score = jax.lax.fori_loop(1, S, num_step, score)
    seq_ends = jnp.sum(mask.astype(jnp.int32), axis=1) - 1
    last_tags = jnp.take_along_axis(tags, seq_ends[:, None], axis=1)[:, 0]
    score = score + end_t[last_tags]

    alpha0 = start_t[None, :] + emissions[:, 0]

    def den_step(i, alpha):
        em_i = jax.lax.dynamic_index_in_dim(emissions, i, axis=1, keepdims=False)
        nxt = jax.nn.logsumexp(alpha[:, :, None] + trans[None, :, :] + em_i[:, None, :],
                               axis=1)
        m_i = jax.lax.dynamic_index_in_dim(mask, i, axis=1, keepdims=False)
        return jnp.where(m_i[:, None], nxt, alpha)

    alpha = jax.lax.fori_loop(1, S, den_step, alpha0)
    denom = jax.nn.logsumexp(alpha + end_t[None, :], axis=1)
    llh = score - denom
    return -(jnp.sum(llh) / jnp.sum(mask_f))


def init_params(key, cfg):
    """Deterministic synthetic parameters (shapes follow the module __init__)."""
    ks = jax.random.split(key, 16)
    H = cfg['hidden']
    p = {}
    p['tok_emb'] = 0.02 * jax.random.normal(ks[0], (cfg['tok_vocab'], H), jnp.float32)
    p['seg_emb'] = 0.02 * jax.random.normal(ks[1], (2, H), jnp.float32)
    p['w_low'] = jax.random.normal(ks[2], (H, H), jnp.float32) / math.sqrt(H)
    p['w_high'] = jax.random.normal(ks[3], (H, H), jnp.float32) / math.sqrt(H)
    p['ner_emb'] = 0.1 * jax.random.normal(ks[4], (cfg['K_ner'], cfg['ner_emb']), jnp.float32)
    p['mod_emb'] = 0.1 * jax.random.normal(ks[5], (cfg['K_mod'], cfg['mod_emb']), jnp.float32)
    p['crf_w'] = jax.random.normal(ks[6], (H, cfg['K_ner']), jnp.float32) / math.sqrt(H)
    p['crf_b'] = jnp.zeros((cfg['K_ner'],), jnp.float32)
    p['crf_start'] = 0.1 * jax.random.uniform(ks[7], (cfg['K_ner'],), jnp.float32, -1.0, 1.0)
    p['crf_end'] = 0.1 * jax.random.uniform(ks[8], (cfg['K_ner'],), jnp.float32, -1.0, 1.0)
    p['crf_trans'] = 0.1 * jax.random.uniform(ks[9], (cfg['K_ner'], cfg['K_ner']),
                                              jnp.float32, -1.0, 1.0)
    d_mod = H + cfg['ner_emb']
    p['mod_w'] = jax.random.normal(ks[10], (d_mod, cfg['K_mod']), jnp.float32) / math.sqrt(d_mod)
    p['mod_b'] = jnp.zeros((cfg['K_mod'],), jnp.float32)
    d_sel = H + cfg['ner_emb'] + cfg['mod_emb']
    bound = math.sqrt(6.0 / d_sel)  # kaiming_uniform-style bound
    p['sel_u'] = jax.random.uniform(ks[11], (d_sel, cfg['rel_emb']), jnp.float32, -bound, bound)
    p['sel_v'] = jax.random.uniform(ks[12], (d_sel, cfg['rel_emb']), jnp.float32, -bound, bound)
    p['rel_w'] = jax.random.uniform(ks[13], (cfg['rel_emb'], cfg['K_rel']), jnp.float32, -0.3, 0.3)
    return p


def forward_train(p, tokens, mask, sent_mask, ner_gold, mod_gold, rel_gold):
    """Training-path forward: returns (crf_loss, mod_loss, rel_loss)."""
    B, S = tokens.shape
    H = p['tok_emb'].shape[1]
    mask_f = mask.astype(jnp.float32)
    n_tok = jnp.sum(mask_f)

    # TODO(synk): BertModel.from_pretrained is an external pretrained encoder; replaced
    # by a deterministic token+segment embedding with two fused tanh projection
    # stand-ins for all_hiddens[6] (low_o) and all_hiddens[12] (high_o).
    emb = p['tok_emb'][tokens] + p['seg_emb'][sent_mask]            # [B, S, H]
    emb2d = emb.reshape(B * S, H)
    w_enc = jnp.concatenate([p['w_low'], p['w_high']], axis=1)      # (H, 2H) fused
    enc = linear_pallas(emb2d, w_enc, jnp.zeros((2 * H,), jnp.float32), apply_tanh=True)
    low2d = enc[:, :H]
    low_o = low2d.reshape(B, S, H)
    high_o = enc[:, H:].reshape(B, S, H)

    # ---- NER emission (Pallas matmul) + CRF NLL ----
    K_ner = p['crf_w'].shape[1]
    ner_logits = linear_pallas(low2d, p['crf_w'], p['crf_b']).reshape(B, S, K_ner)
    crf_loss = crf_nll_token_mean(ner_logits, ner_gold, mask,
                                  p['crf_start'], p['crf_end'], p['crf_trans'])

    # ---- modality head: concat(low_o, ner_emb) -> fused linear + masked CE ----
    ner_out = p['ner_emb'][ner_gold]                                # [B, S, ner_emb]
    o1 = jnp.concatenate([low_o, ner_out], axis=2).reshape(B * S, -1)
    mod_loss = masked_ce_sum_pallas(o1, p['mod_w'], p['mod_b'],
                                    mod_gold.reshape(-1), mask_f.reshape(-1)) / n_tok

    # ---- multi-head selection: fused [sel_u|sel_v] projection, then tiled BCE ----
    mod_out = p['mod_emb'][mod_gold]
    o2 = jnp.concatenate([high_o, ner_out, mod_out], axis=-1)       # [B, S, d_sel]
    d_sel = o2.shape[-1]
    R = p['sel_u'].shape[1]
    w_sel = jnp.concatenate([p['sel_u'], p['sel_v']], axis=1)       # (d_sel, 2R) fused
    uvp = linear_pallas(o2.reshape(B * S, d_sel), w_sel, jnp.zeros((2 * R,), jnp.float32))
    u = uvp[:, :R].reshape(B, S, R)
    vT = jnp.transpose(uvp[:, R:].reshape(B, S, R), (0, 2, 1))      # (B, R, S)
    # TODO(synk): nn.Dropout(p=0.1) on tanh(uv) is treated as eval-mode identity.
    rel_loss = rel_bce_sum_pallas(u, vT, p['rel_w'], rel_gold, mask_f) / n_tok

    return crf_loss, mod_loss, rel_loss


if __name__ == "__main__":
    cfg = dict(tok_vocab=50, hidden=32, ner_emb=8, K_ner=8,
               mod_emb=8, K_mod=4, rel_emb=16, K_rel=4)
    B, S = 2, 8

    key = jax.random.PRNGKey(0)
    kp, k1, k2, k3, k4 = jax.random.split(key, 5)
    params = init_params(kp, cfg)

    tokens = jax.random.randint(k1, (B, S), 0, cfg['tok_vocab'], dtype=jnp.int32)
    sent_mask = jnp.zeros((B, S), jnp.int32)                  # token_type_ids
    lengths = jnp.array([S, S - 2], jnp.int32)
    mask = jnp.arange(S)[None, :] < lengths[:, None]          # bool [B, S]; mask[:,0]=True
    ner_gold = jax.random.randint(k2, (B, S), 0, cfg['K_ner'], dtype=jnp.int32)
    mod_gold = jax.random.randint(k3, (B, S), 0, cfg['K_mod'], dtype=jnp.int32)
    # rel_gold in the module's native [B, S, K_rel, S] layout (no host transpose)
    rel_gold = jax.random.bernoulli(k4, 0.1, (B, S, cfg['K_rel'], S)).astype(jnp.float32)

    fwd = jax.jit(forward_train)
    losses = fwd(params, tokens, mask, sent_mask, ner_gold, mod_gold, rel_gold)
    jax.block_until_ready(losses)
    print("KERNEL_OK")
</pallas_src>

<mosaic_0001>
module attributes {stable_mosaic.version = 11 : i64} {
  func.func @_linear_kernel(%arg0: i32, %arg1: memref<16x32xbf16, #tpu.memory_space<vmem>>, %arg2: memref<32x64xbf16, #tpu.memory_space<vmem>>, %arg3: memref<1x64xf32, #tpu.memory_space<vmem>>, %arg4: memref<16x64xf32, #tpu.memory_space<vmem>>) attributes {dimension_semantics = [#tpu.dimension_semantics<parallel>], iteration_bounds = array<i64: 1>, scalar_prefetch = 0 : i64, scratch_operands = 0 : i64, tpu.core_type = #tpu.core_type<tc>, window_params = [{transform_indices = @transform_0, window_bounds = array<i64: 16, 32>}, {pipeline_mode = #tpu.pipeline_mode<synchronous>, transform_indices = @transform_1, window_bounds = array<i64: 32, 64>}, {pipeline_mode = #tpu.pipeline_mode<synchronous>, transform_indices = @transform_2, window_bounds = array<i64: 1, 64>}, {transform_indices = @transform_3, window_bounds = array<i64: 16, 64>}]} {
    %c0 = arith.constant 0 : index
    %c0_0 = arith.constant 0 : index
    %0 = vector.load %arg1[%c0, %c0_0] : memref<16x32xbf16, #tpu.memory_space<vmem>>, vector<16x32xbf16>
    %c0_1 = arith.constant 0 : index
    %c0_2 = arith.constant 0 : index
    %1 = vector.load %arg2[%c0_1, %c0_2] : memref<32x64xbf16, #tpu.memory_space<vmem>>, vector<32x64xbf16>
    %cst = arith.constant dense<0.000000e+00> : vector<16x64xf32>
    %2 = tpu.matmul %0, %1, %cst {dimension_numbers = #tpu.dot_dimension_numbers<[1], [0], [0], [1], [0, 0, 1, 1], [], []>} : vector<16x32xbf16>, vector<32x64xbf16>, vector<16x64xf32> -> vector<16x64xf32>
    %c0_3 = arith.constant 0 : index
    %c0_4 = arith.constant 0 : index
    %3 = vector.load %arg3[%c0_3, %c0_4] : memref<1x64xf32, #tpu.memory_space<vmem>>, vector<1x64xf32>
    %4 = vector.broadcast %3 : vector<1x64xf32> to vector<16x64xf32>
    %5 = arith.addf %2, %4 : vector<16x64xf32>
    %6 = math.tanh %5 : vector<16x64xf32>
    %c0_5 = arith.constant 0 : index
    %c0_6 = arith.constant 0 : index
    %7 = vector.load %arg4[%c0_5, %c0_6] : memref<16x64xf32, #tpu.memory_space<vmem>>, vector<16x64xf32>
    tpu.vector_store %arg4[%c0_5, %c0_6], %6 {strides = array<i32>} : memref<16x64xf32, #tpu.memory_space<vmem>>, vector<16x64xf32>,
    return
  }
  func.func @transform_0(%arg0: i32) -> (i32, i32) {
    %c0_i32 = arith.constant 0 : i32
    %c0_i32_0 = arith.constant 0 : i32
    return %arg0, %c0_i32 : i32, i32
  }
  func.func @transform_1(%arg0: i32) -> (i32, i32) {
    %c0_i32 = arith.constant 0 : i32
    %c0_i32_0 = arith.constant 0 : i32
    %c0_i32_1 = arith.constant 0 : i32
    return %c0_i32, %c0_i32_0 : i32, i32
  }
  func.func @transform_2(%arg0: i32) -> (i32, i32) {
    %c0_i32 = arith.constant 0 : i32
    %c0_i32_0 = arith.constant 0 : i32
    %c0_i32_1 = arith.constant 0 : i32
    return %c0_i32, %c0_i32_0 : i32, i32
  }
  func.func @transform_3(%arg0: i32) -> (i32, i32) {
    %c0_i32 = arith.constant 0 : i32
    %c0_i32_0 = arith.constant 0 : i32
    return %arg0, %c0_i32 : i32, i32
  }
}

module attributes {stable_mosaic.version = 11 : i64} {
  func.func @_linear_kernel(%arg0: i32, %arg1: memref<16x32xbf16, #tpu.memory_space<vmem>>, %arg2: memref<32x8xbf16, #tpu.memory_space<vmem>>, %arg3: memref<1x8xf32, #tpu.memory_space<vmem>>, %arg4: memref<16x8xf32, #tpu.memory_space<vmem>>) attributes {dimension_semantics = [#tpu.dimension_semantics<parallel>], iteration_bounds = array<i64: 1>, scalar_prefetch = 0 : i64, scratch_operands = 0 : i64, tpu.core_type = #tpu.core_type<tc>, window_params = [{transform_indices = @transform_0, window_bounds = array<i64: 16, 32>}, {pipeline_mode = #tpu.pipeline_mode<synchronous>, transform_indices = @transform_1, window_bounds = array<i64: 32, 8>}, {pipeline_mode = #tpu.pipeline_mode<synchronous>, transform_indices = @transform_2, window_bounds = array<i64: 1, 8>}, {transform_indices = @transform_3, window_bounds = array<i64: 16, 8>}]} {
    %c0 = arith.constant 0 : index
    %c0_0 = arith.constant 0 : index
    %0 = vector.load %arg1[%c0, %c0_0] : memref<16x32xbf16, #tpu.memory_space<vmem>>, vector<16x32xbf16>
    %c0_1 = arith.constant 0 : index
    %c0_2 = arith.constant 0 : index
    %1 = vector.load %arg2[%c0_1, %c0_2] : memref<32x8xbf16, #tpu.memory_space<vmem>>, vector<32x8xbf16>
    %cst = arith.constant dense<0.000000e+00> : vector<16x8xf32>
    %2 = tpu.matmul %0, %1, %cst {dimension_numbers = #tpu.dot_dimension_numbers<[1], [0], [0], [1], [0, 0, 1, 1], [], []>} : vector<16x32xbf16>, vector<32x8xbf16>, vector<16x8xf32> -> vector<16x8xf32>
    %c0_3 = arith.constant 0 : index
    %c0_4 = arith.constant 0 : index
    %3 = vector.load %arg3[%c0_3, %c0_4] : memref<1x8xf32, #tpu.memory_space<vmem>>, vector<1x8xf32>
    %4 = vector.broadcast %3 : vector<1x8xf32> to vector<16x8xf32>
    %5 = arith.addf %2, %4 : vector<16x8xf32>
    %c0_5 = arith.constant 0 : index
    %c0_6 = arith.constant 0 : index
    %6 = vector.load %arg4[%c0_5, %c0_6] : memref<16x8xf32, #tpu.memory_space<vmem>>, vector<16x8xf32>
    tpu.vector_store %arg4[%c0_5, %c0_6], %5 {strides = array<i32>} : memref<16x8xf32, #tpu.memory_space<vmem>>, vector<16x8xf32>,
    return
  }
  func.func @transform_0(%arg0: i32) -> (i32, i32) {
    %c0_i32 = arith.constant 0 : i32
    %c0_i32_0 = arith.constant 0 : i32
    return %arg0, %c0_i32 : i32, i32
  }
  func.func @transform_1(%arg0: i32) -> (i32, i32) {
    %c0_i32 = arith.constant 0 : i32
    %c0_i32_0 = arith.constant 0 : i32
    %c0_i32_1 = arith.constant 0 : i32
    return %c0_i32, %c0_i32_0 : i32, i32
  }
  func.func @transform_2(%arg0: i32) -> (i32, i32) {
    %c0_i32 = arith.constant 0 : i32
    %c0_i32_0 = arith.constant 0 : i32
    %c0_i32_1 = arith.constant 0 : i32
    return %c0_i32, %c0_i32_0 : i32, i32
  }
  func.func @transform_3(%arg0: i32) -> (i32, i32) {
    %c0_i32 = arith.constant 0 : i32
    %c0_i32_0 = arith.constant 0 : i32
    return %arg0, %c0_i32 : i32, i32
  }
}

module attributes {stable_mosaic.version = 11 : i64} {
  func.func @_mod_ce_kernel(%arg0: i32, %arg1: memref<16x40xbf16, #tpu.memory_space<vmem>>, %arg2: memref<40x4xbf16, #tpu.memory_space<vmem>>, %arg3: memref<1x4xf32, #tpu.memory_space<vmem>>, %arg4: memref<16x1xi32, #tpu.memory_space<vmem>>, %arg5: memref<16x1xf32, #tpu.memory_space<vmem>>, %arg6: memref<1x128xf32, #tpu.memory_space<vmem>>) attributes {dimension_semantics = [#tpu.dimension_semantics<arbitrary>], iteration_bounds = array<i64: 1>, scalar_prefetch = 0 : i64, scratch_operands = 0 : i64, tpu.core_type = #tpu.core_type<tc>, window_params = [{transform_indices = @transform_0, window_bounds = array<i64: 16, 40>}, {pipeline_mode = #tpu.pipeline_mode<synchronous>, transform_indices = @transform_1, window_bounds = array<i64: 40, 4>}, {pipeline_mode = #tpu.pipeline_mode<synchronous>, transform_indices = @transform_2, window_bounds = array<i64: 1, 4>}, {transform_indices = @transform_3, window_bounds = array<i64: 16, 1>}, {transform_indices = @transform_4, window_bounds = array<i64: 16, 1>}, {pipeline_mode = #tpu.pipeline_mode<synchronous>, transform_indices = @transform_5, window_bounds = array<i64: 1, 128>}]} {
    %c0_i32 = arith.constant 0 : i32
    %0 = arith.cmpi eq, %arg0, %c0_i32 : i32
    %1 = arith.extui %0 : i1 to i32
    %c0_i32_0 = arith.constant 0 : i32
    %2 = arith.cmpi ne, %1, %c0_i32_0 : i32
    scf.if %2 {
      %cst_19 = arith.constant 0.000000e+00 : f32
      %37 = vector.broadcast %cst_19 : f32 to vector<1x128xf32>
      %c0_20 = arith.constant 0 : index
      %c0_21 = arith.constant 0 : index
      %38 = vector.load %arg6[%c0_20, %c0_21] : memref<1x128xf32, #tpu.memory_space<vmem>>, vector<1x128xf32>
      tpu.vector_store %arg6[%c0_20, %c0_21], %37 {strides = array<i32>} : memref<1x128xf32, #tpu.memory_space<vmem>>, vector<1x128xf32>,
    } else {
    }
    %c0 = arith.constant 0 : index
    %c0_1 = arith.constant 0 : index
    %3 = vector.load %arg1[%c0, %c0_1] : memref<16x40xbf16, #tpu.memory_space<vmem>>, vector<16x40xbf16>
    %c0_2 = arith.constant 0 : index
    %c0_3 = arith.constant 0 : index
    %4 = vector.load %arg2[%c0_2, %c0_3] : memref<40x4xbf16, #tpu.memory_space<vmem>>, vector<40x4xbf16>
    %cst = arith.constant dense<0.000000e+00> : vector<16x4xf32>
    %5 = tpu.matmul %3, %4, %cst {dimension_numbers = #tpu.dot_dimension_numbers<[1], [0], [0], [1], [0, 0, 1, 1], [], []>} : vector<16x40xbf16>, vector<40x4xbf16>, vector<16x4xf32> -> vector<16x4xf32>
    %c0_4 = arith.constant 0 : index
    %c0_5 = arith.constant 0 : index
    %6 = vector.load %arg3[%c0_4, %c0_5] : memref<1x4xf32, #tpu.memory_space<vmem>>, vector<1x4xf32>
    %7 = vector.broadcast %6 : vector<1x4xf32> to vector<16x4xf32>
    %8 = arith.addf %5, %7 : vector<16x4xf32>
    %c0_6 = arith.constant 0 : index
    %c0_7 = arith.constant 0 : index
    %9 = vector.load %arg4[%c0_6, %c0_7] : memref<16x1xi32, #tpu.memory_space<vmem>>, vector<16x1xi32>
    %c0_8 = arith.constant 0 : index
    %c0_9 = arith.constant 0 : index
    %10 = vector.load %arg5[%c0_8, %c0_9] : memref<16x1xf32, #tpu.memory_space<vmem>>, vector<16x1xf32>
    %cst_10 = arith.constant dense<0xFF800000> : vector<16xf32>
    %11 = vector.multi_reduction <maximumf>, %8, %cst_10 [1] : vector<16x4xf32> to vector<16xf32>
    %12 = vector.shape_cast %11 : vector<16xf32> to vector<16x1xf32>
    %13 = vector.broadcast %12 : vector<16x1xf32> to vector<16x4xf32>
    %14 = arith.subf %8, %13 : vector<16x4xf32>
    %15 = math.exp %14 : vector<16x4xf32>
    %cst_11 = arith.constant dense<0.000000e+00> : vector<16xf32>
    %16 = vector.multi_reduction <add>, %15, %cst_11 [1] : vector<16x4xf32> to vector<16xf32>
    %17 = vector.shape_cast %16 : vector<16xf32> to vector<16x1xf32>
    %18 = math.log %17 : vector<16x1xf32>
    %19 = arith.addf %12, %18 : vector<16x1xf32>
    %20 = tpu.iota {dimensions = array<i32: 1>} : vector<16x4xi32>
    %21 = vector.broadcast %9 : vector<16x1xi32> to vector<16x4xi32>
    %22 = arith.cmpi eq, %20, %21 : vector<16x4xi32>
    %cst_12 = arith.constant 0.000000e+00 : f32
    %23 = vector.broadcast %cst_12 : f32 to vector<16x4xf32>
    %24 = arith.select %22, %8, %23 : vector<16x4xi1>, vector<16x4xf32>
    %cst_13 = arith.constant dense<0.000000e+00> : vector<16xf32>
    %25 = vector.multi_reduction <add>, %24, %cst_13 [1] : vector<16x4xf32> to vector<16xf32>
    %26 = vector.shape_cast %25 : vector<16xf32> to vector<16x1xf32>
    %c0_14 = arith.constant 0 : index
    %c0_15 = arith.constant 0 : index
    %27 = vector.load %arg6[%c0_14, %c0_15] : memref<1x128xf32, #tpu.memory_space<vmem>>, vector<1x128xf32>
    %28 = arith.subf %19, %26 : vector<16x1xf32>
    %29 = arith.mulf %28, %10 : vector<16x1xf32>
    %30 = vector.shape_cast %29 : vector<16x1xf32> to vector<1x16x1xf32>
    %cst_16 = arith.constant dense<0.000000e+00> : vector<1xf32>
    %31 = vector.multi_reduction <add>, %30, %cst_16 [1, 2] : vector<1x16x1xf32> to vector<1xf32>
    %32 = vector.shape_cast %31 : vector<1xf32> to vector<1x1x1xf32>
    %33 = vector.extract %32[0, 0, 0] : f32 from vector<1x1x1xf32>
    %34 = vector.broadcast %33 : f32 to vector<1x128xf32>
    %35 = arith.addf %27, %34 : vector<1x128xf32>
    %c0_17 = arith.constant 0 : index
    %c0_18 = arith.constant 0 : index
    %36 = vector.load %arg6[%c0_17, %c0_18] : memref<1x128xf32, #tpu.memory_space<vmem>>, vector<1x128xf32>
    tpu.vector_store %arg6[%c0_17, %c0_18], %35 {strides = array<i32>} : memref<1x128xf32, #tpu.memory_space<vmem>>, vector<1x128xf32>,
    return
  }
  func.func @transform_0(%arg0: i32) -> (i32, i32) {
    %c0_i32 = arith.constant 0 : i32
    %c0_i32_0 = arith.constant 0 : i32
    return %arg0, %c0_i32 : i32, i32
  }
  func.func @transform_1(%arg0: i32) -> (i32, i32) {
    %c0_i32 = arith.constant 0 : i32
    %c0_i32_0 = arith.constant 0 : i32
    %c0_i32_1 = arith.constant 0 : i32
    return %c0_i32, %c0_i32_0 : i32, i32
  }
  func.func @transform_2(%arg0: i32) -> (i32, i32) {
    %c0_i32 = arith.constant 0 : i32
    %c0_i32_0 = arith.constant 0 : i32
    %c0_i32_1 = arith.constant 0 : i32
    return %c0_i32, %c0_i32_0 : i32, i32
  }
  func.func @transform_3(%arg0: i32) -> (i32, i32) {
    %c0_i32 = arith.constant 0 : i32
    %c0_i32_0 = arith.constant 0 : i32
    return %arg0, %c0_i32 : i32, i32
  }
  func.func @transform_4(%arg0: i32) -> (i32, i32) {
    %c0_i32 = arith.constant 0 : i32
    %c0_i32_0 = arith.constant 0 : i32
    return %arg0, %c0_i32 : i32, i32
  }
  func.func @transform_5(%arg0: i32) -> (i32, i32) {
    %c0_i32 = arith.constant 0 : i32
    %c0_i32_0 = arith.constant 0 : i32
    %c0_i32_1 = arith.constant 0 : i32
    return %c0_i32, %c0_i32_0 : i32, i32
  }
}

module attributes {stable_mosaic.version = 11 : i64} {
  func.func @_linear_kernel(%arg0: i32, %arg1: memref<16x48xbf16, #tpu.memory_space<vmem>>, %arg2: memref<48x32xbf16, #tpu.memory_space<vmem>>, %arg3: memref<1x32xf32, #tpu.memory_space<vmem>>, %arg4: memref<16x32xf32, #tpu.memory_space<vmem>>) attributes {dimension_semantics = [#tpu.dimension_semantics<parallel>], iteration_bounds = array<i64: 1>, scalar_prefetch = 0 : i64, scratch_operands = 0 : i64, tpu.core_type = #tpu.core_type<tc>, window_params = [{transform_indices = @transform_0, window_bounds = array<i64: 16, 48>}, {pipeline_mode = #tpu.pipeline_mode<synchronous>, transform_indices = @transform_1, window_bounds = array<i64: 48, 32>}, {pipeline_mode = #tpu.pipeline_mode<synchronous>, transform_indices = @transform_2, window_bounds = array<i64: 1, 32>}, {transform_indices = @transform_3, window_bounds = array<i64: 16, 32>}]} {
    %c0 = arith.constant 0 : index
    %c0_0 = arith.constant 0 : index
    %0 = vector.load %arg1[%c0, %c0_0] : memref<16x48xbf16, #tpu.memory_space<vmem>>, vector<16x48xbf16>
    %c0_1 = arith.constant 0 : index
    %c0_2 = arith.constant 0 : index
    %1 = vector.load %arg2[%c0_1, %c0_2] : memref<48x32xbf16, #tpu.memory_space<vmem>>, vector<48x32xbf16>
    %cst = arith.constant dense<0.000000e+00> : vector<16x32xf32>
    %2 = tpu.matmul %0, %1, %cst {dimension_numbers = #tpu.dot_dimension_numbers<[1], [0], [0], [1], [0, 0, 1, 1], [], []>} : vector<16x48xbf16>, vector<48x32xbf16>, vector<16x32xf32> -> vector<16x32xf32>
    %c0_3 = arith.constant 0 : index
    %c0_4 = arith.constant 0 : index
    %3 = vector.load %arg3[%c0_3, %c0_4] : memref<1x32xf32, #tpu.memory_space<vmem>>, vector<1x32xf32>
    %4 = vector.broadcast %3 : vector<1x32xf32> to vector<16x32xf32>
    %5 = arith.addf %2, %4 : vector<16x32xf32>
    %c0_5 = arith.constant 0 : index
    %c0_6 = arith.constant 0 : index
    %6 = vector.load %arg4[%c0_5, %c0_6] : memref<16x32xf32, #tpu.memory_space<vmem>>, vector<16x32xf32>
    tpu.vector_store %arg4[%c0_5, %c0_6], %5 {strides = array<i32>} : memref<16x32xf32, #tpu.memory_space<vmem>>, vector<16x32xf32>,
    return
  }
  func.func @transform_0(%arg0: i32) -> (i32, i32) {
    %c0_i32 = arith.constant 0 : i32
    %c0_i32_0 = arith.constant 0 : i32
    return %arg0, %c0_i32 : i32, i32
  }
  func.func @transform_1(%arg0: i32) -> (i32, i32) {
    %c0_i32 = arith.constant 0 : i32
    %c0_i32_0 = arith.constant 0 : i32
    %c0_i32_1 = arith.constant 0 : i32
    return %c0_i32, %c0_i32_0 : i32, i32
  }
  func.func @transform_2(%arg0: i32) -> (i32, i32) {
    %c0_i32 = arith.constant 0 : i32
    %c0_i32_0 = arith.constant 0 : i32
    %c0_i32_1 = arith.constant 0 : i32
    return %c0_i32, %c0_i32_0 : i32, i32
  }
  func.func @transform_3(%arg0: i32) -> (i32, i32) {
    %c0_i32 = arith.constant 0 : i32
    %c0_i32_0 = arith.constant 0 : i32
    return %arg0, %c0_i32 : i32, i32
  }
}

module attributes {stable_mosaic.version = 11 : i64} {
  func.func @_rel_bce_kernel(%arg0: i32, %arg1: i32, %arg2: i32, %arg3: memref<1x8x16xf32, #tpu.memory_space<vmem>>, %arg4: memref<1x16x8xf32, #tpu.memory_space<vmem>>, %arg5: memref<16x4xf32, #tpu.memory_space<smem>>, %arg6: memref<1x8x4x8xbf16, #tpu.memory_space<vmem>>, %arg7: memref<1x8x1xf32, #tpu.memory_space<vmem>>, %arg8: memref<1x1x8xf32, #tpu.memory_space<vmem>>, %arg9: memref<1x1x128xf32, #tpu.memory_space<vmem>>) attributes {dimension_semantics = [#tpu.dimension_semantics<parallel>, #tpu.dimension_semantics<arbitrary>, #tpu.dimension_semantics<arbitrary>], iteration_bounds = array<i64: 2, 1, 1>, scalar_prefetch = 0 : i64, scratch_operands = 0 : i64, tpu.core_type = #tpu.core_type<tc>, window_params = [{transform_indices = @transform_0, window_bounds = array<i64: 1, 8, 16>}, {transform_indices = @transform_1, window_bounds = array<i64: 1, 16, 8>}, {transform_indices = @transform_2, window_bounds = array<i64: 16, 4>}, {transform_indices = @transform_3, window_bounds = array<i64: 1, 8, 4, 8>}, {transform_indices = @transform_4, window_bounds = array<i64: 1, 8, 1>}, {transform_indices = @transform_5, window_bounds = array<i64: 1, 1, 8>}, {transform_indices = @transform_6, window_bounds = array<i64: 1, 1, 128>}]} {
    %c0_i32 = arith.constant 0 : i32
    %0 = arith.cmpi eq, %arg1, %c0_i32 : i32
    %c0_i32_0 = arith.constant 0 : i32
    %1 = arith.cmpi eq, %arg2, %c0_i32_0 : i32
    %2 = arith.andi %0, %1 : i1
    %3 = arith.extui %2 : i1 to i32
    %c0_i32_1 = arith.constant 0 : i32
    %4 = arith.cmpi ne, %3, %c0_i32_1 : i32
    scf.if %4 {
      %cst_152 = arith.constant 0.000000e+00 : f32
      %451 = vector.broadcast %cst_152 : f32 to vector<1x1x128xf32>
      %c0_153 = arith.constant 0 : index
      %c0_154 = arith.constant 0 : index
      %c0_155 = arith.constant 0 : index
      %452 = vector.load %arg9[%c0_153, %c0_154, %c0_155] : memref<1x1x128xf32, #tpu.memory_space<vmem>>, vector<1x1x128xf32>
      tpu.vector_store %arg9[%c0_153, %c0_154, %c0_155], %451 {strides = array<i32>} : memref<1x1x128xf32, #tpu.memory_space<vmem>>, vector<1x1x128xf32>,
    } else {
    }
    %c0 = arith.constant 0 : index
    %c0_2 = arith.constant 0 : index
    %c0_3 = arith.constant 0 : index
    %5 = vector.load %arg3[%c0, %c0_2, %c0_3] : memref<1x8x16xf32, #tpu.memory_space<vmem>>, vector<1x8x16xf32>
    %6 = vector.shape_cast %5 : vector<1x8x16xf32> to vector<8x16xf32>
    %c0_4 = arith.constant 0 : index
    %c0_5 = arith.constant 0 : index
    %c0_6 = arith.constant 0 : index
    %7 = vector.load %arg4[%c0_4, %c0_5, %c0_6] : memref<1x16x8xf32, #tpu.memory_space<vmem>>, vector<1x16x8xf32>
    %8 = vector.shape_cast %7 : vector<1x16x8xf32> to vector<16x8xf32>
    %c0_7 = arith.constant 0 : index
    %c0_8 = arith.constant 0 : index
    %c0_9 = arith.constant 0 : index
    %c0_10 = arith.constant 0 : index
    %9 = vector.load %arg6[%c0_7, %c0_8, %c0_9, %c0_10] : memref<1x8x4x8xbf16, #tpu.memory_space<vmem>>, vector<1x8x4x8xbf16>
    %10 = vector.shape_cast %9 : vector<1x8x4x8xbf16> to vector<8x4x8xbf16>
    %11 = arith.extf %10 : vector<8x4x8xbf16> to vector<8x4x8xf32>
    %c0_11 = arith.constant 0 : index
    %c0_12 = arith.constant 0 : index
    %c0_13 = arith.constant 0 : index
    %12 = vector.load %arg7[%c0_11, %c0_12, %c0_13] : memref<1x8x1xf32, #tpu.memory_space<vmem>>, vector<1x8x1xf32>
    %13 = vector.shape_cast %12 : vector<1x8x1xf32> to vector<8x1xf32>
    %c0_14 = arith.constant 0 : index
    %c0_15 = arith.constant 0 : index
    %c0_16 = arith.constant 0 : index
    %14 = vector.load %arg8[%c0_14, %c0_15, %c0_16] : memref<1x1x8xf32, #tpu.memory_space<vmem>>, vector<1x1x8xf32>
    %15 = vector.shape_cast %14 : vector<1x1x8xf32> to vector<1x8xf32>
    %16 = vector.broadcast %13 : vector<8x1xf32> to vector<8x8xf32>
    %17 = vector.broadcast %15 : vector<1x8xf32> to vector<8x8xf32>
    %18 = arith.mulf %16, %17 : vector<8x8xf32>
    %cst = arith.constant 0.000000e+00 : f32
    %19 = vector.broadcast %cst : f32 to vector<8x8xf32>
    %cst_17 = arith.constant 0.000000e+00 : f32
    %20 = vector.broadcast %cst_17 : f32 to vector<8x8xf32>
    %cst_18 = arith.constant 0.000000e+00 : f32
    %21 = vector.broadcast %cst_18 : f32 to vector<8x8xf32>
    %cst_19 = arith.constant 0.000000e+00 : f32
    %22 = vector.broadcast %cst_19 : f32 to vector<8x8xf32>
    %23 = vector.extract_strided_slice %6 {offsets = [0, 0], sizes = [8, 1], strides = [1, 1]} : vector<8x16xf32> to vector<8x1xf32>
    %24 = vector.extract_strided_slice %8 {offsets = [0, 0], sizes = [1, 8], strides = [1, 1]} : vector<16x8xf32> to vector<1x8xf32>
    %25 = vector.broadcast %23 : vector<8x1xf32> to vector<8x8xf32>
    %26 = vector.broadcast %24 : vector<1x8xf32> to vector<8x8xf32>
    %27 = arith.addf %25, %26 : vector<8x8xf32>
    %28 = math.tanh %27 : vector<8x8xf32>
    %c0_20 = arith.constant 0 : index
    %c0_21 = arith.constant 0 : index
    %29 = memref.load %arg5[%c0_20, %c0_21] : memref<16x4xf32, #tpu.memory_space<smem>>
    %30 = vector.broadcast %29 : f32 to vector<8x8xf32>
    %31 = arith.mulf %30, %28 : vector<8x8xf32>
    %32 = arith.addf %19, %31 : vector<8x8xf32>
    %c0_22 = arith.constant 0 : index
    %c1 = arith.constant 1 : index
    %33 = memref.load %arg5[%c0_22, %c1] : memref<16x4xf32, #tpu.memory_space<smem>>
    %34 = vector.broadcast %33 : f32 to vector<8x8xf32>
    %35 = arith.mulf %34, %28 : vector<8x8xf32>
    %36 = arith.addf %20, %35 : vector<8x8xf32>
    %c0_23 = arith.constant 0 : index
    %c2 = arith.constant 2 : index
    %37 = memref.load %arg5[%c0_23, %c2] : memref<16x4xf32, #tpu.memory_space<smem>>
    %38 = vector.broadcast %37 : f32 to vector<8x8xf32>
    %39 = arith.mulf %38, %28 : vector<8x8xf32>
    %40 = arith.addf %21, %39 : vector<8x8xf32>
    %c0_24 = arith.constant 0 : index
    %c3 = arith.constant 3 : index
    %41 = memref.load %arg5[%c0_24, %c3] : memref<16x4xf32, #tpu.memory_space<smem>>
    %42 = vector.broadcast %41 : f32 to vector<8x8xf32>
    %43 = arith.mulf %42, %28 : vector<8x8xf32>
    %44 = arith.addf %22, %43 : vector<8x8xf32>
    %45 = vector.extract_strided_slice %6 {offsets = [0, 1], sizes = [8, 1], strides = [1, 1]} : vector<8x16xf32> to vector<8x1xf32>
    %46 = vector.extract_strided_slice %8 {offsets = [1, 0], sizes = [1, 8], strides = [1, 1]} : vector<16x8xf32> to vector<1x8xf32>
    %47 = vector.broadcast %45 : vector<8x1xf32> to vector<8x8xf32>
    %48 = vector.broadcast %46 : vector<1x8xf32> to vector<8x8xf32>
    %49 = arith.addf %47, %48 : vector<8x8xf32>
    %50 = math.tanh %49 : vector<8x8xf32>
    %c1_25 = arith.constant 1 : index
    %c0_26 = arith.constant 0 : index
    %51 = memref.load %arg5[%c1_25, %c0_26] : memref<16x4xf32, #tpu.memory_space<smem>>
    %52 = vector.broadcast %51 : f32 to vector<8x8xf32>
    %53 = arith.mulf %52, %50 : vector<8x8xf32>
    %54 = arith.addf %32, %53 : vector<8x8xf32>
    %c1_27 = arith.constant 1 : index
    %c1_28 = arith.constant 1 : index
    %55 = memref.load %arg5[%c1_27, %c1_28] : memref<16x4xf32, #tpu.memory_space<smem>>
    %56 = vector.broadcast %55 : f32 to vector<8x8xf32>
    %57 = arith.mulf %56, %50 : vector<8x8xf32>
    %58 = arith.addf %36, %57 : vector<8x8xf32>
    %c1_29 = arith.constant 1 : index
    %c2_30 = arith.constant 2 : index
    %59 = memref.load %arg5[%c1_29, %c2_30] : memref<16x4xf32, #tpu.memory_space<smem>>
    %60 = vector.broadcast %59 : f32 to vector<8x8xf32>
    %61 = arith.mulf %60, %50 : vector<8x8xf32>
    %62 = arith.addf %40, %61 : vector<8x8xf32>
    %c1_31 = arith.constant 1 : index
    %c3_32 = arith.constant 3 : index
    %63 = memref.load %arg5[%c1_31, %c3_32] : memref<16x4xf32, #tpu.memory_space<smem>>
    %64 = vector.broadcast %63 : f32 to vector<8x8xf32>
    %65 = arith.mulf %64, %50 : vector<8x8xf32>
    %66 = arith.addf %44, %65 : vector<8x8xf32>
    %67 = vector.extract_strided_slice %6 {offsets = [0, 2], sizes = [8, 1], strides = [1, 1]} : vector<8x16xf32> to vector<8x1xf32>
    %68 = vector.extract_strided_slice %8 {offsets = [2, 0], sizes = [1, 8], strides = [1, 1]} : vector<16x8xf32> to vector<1x8xf32>
    %69 = vector.broadcast %67 : vector<8x1xf32> to vector<8x8xf32>
    %70 = vector.broadcast %68 : vector<1x8xf32> to vector<8x8xf32>
    %71 = arith.addf %69, %70 : vector<8x8xf32>
    %72 = math.tanh %71 : vector<8x8xf32>
    %c2_33 = arith.constant 2 : index
    %c0_34 = arith.constant 0 : index
    %73 = memref.load %arg5[%c2_33, %c0_34] : memref<16x4xf32, #tpu.memory_space<smem>>
    %74 = vector.broadcast %73 : f32 to vector<8x8xf32>
    %75 = arith.mulf %74, %72 : vector<8x8xf32>
    %76 = arith.addf %54, %75 : vector<8x8xf32>
    %c2_35 = arith.constant 2 : index
    %c1_36 = arith.constant 1 : index
    %77 = memref.load %arg5[%c2_35, %c1_36] : memref<16x4xf32, #tpu.memory_space<smem>>
    %78 = vector.broadcast %77 : f32 to vector<8x8xf32>
    %79 = arith.mulf %78, %72 : vector<8x8xf32>
    %80 = arith.addf %58, %79 : vector<8x8xf32>
    %c2_37 = arith.constant 2 : index
    %c2_38 = arith.constant 2 : index
    %81 = memref.load %arg5[%c2_37, %c2_38] : memref<16x4xf32, #tpu.memory_space<smem>>
    %82 = vector.broadcast %81 : f32 to vector<8x8xf32>
    %83 = arith.mulf %82, %72 : vector<8x8xf32>
    %84 = arith.addf %62, %83 : vector<8x8xf32>
    %c2_39 = arith.constant 2 : index
    %c3_40 = arith.constant 3 : index
    %85 = memref.load %arg5[%c2_39, %c3_40] : memref<16x4xf32, #tpu.memory_space<smem>>
    %86 = vector.broadcast %85 : f32 to vector<8x8xf32>
    %87 = arith.mulf %86, %72 : vector<8x8xf32>
    %88 = arith.addf %66, %87 : vector<8x8xf32>
    %89 = vector.extract_strided_slice %6 {offsets = [0, 3], sizes = [8, 1], strides = [1, 1]} : vector<8x16xf32> to vector<8x1xf32>
    %90 = vector.extract_strided_slice %8 {offsets = [3, 0], sizes = [1, 8], strides = [1, 1]} : vector<16x8xf32> to vector<1x8xf32>
    %91 = vector.broadcast %89 : vector<8x1xf32> to vector<8x8xf32>
    %92 = vector.broadcast %90 : vector<1x8xf32> to vector<8x8xf32>
    %93 = arith.addf %91, %92 : vector<8x8xf32>
    %94 = math.tanh %93 : vector<8x8xf32>
    %c3_41 = arith.constant 3 : index
    %c0_42 = arith.constant 0 : index
    %95 = memref.load %arg5[%c3_41, %c0_42] : memref<16x4xf32, #tpu.memory_space<smem>>
    %96 = vector.broadcast %95 : f32 to vector<8x8xf32>
    %97 = arith.mulf %96, %94 : vector<8x8xf32>
    %98 = arith.addf %76, %97 : vector<8x8xf32>
    %c3_43 = arith.constant 3 : index
    %c1_44 = arith.constant 1 : index
    %99 = memref.load %arg5[%c3_43, %c1_44] : memref<16x4xf32, #tpu.memory_space<smem>>
    %100 = vector.broadcast %99 : f32 to vector<8x8xf32>
    %101 = arith.mulf %100, %94 : vector<8x8xf32>
    %102 = arith.addf %80, %101 : vector<8x8xf32>
    %c3_45 = arith.constant 3 : index
    %c2_46 = arith.constant 2 : index
    %103 = memref.load %arg5[%c3_45, %c2_46] : memref<16x4xf32, #tpu.memory_space<smem>>
    %104 = vector.broadcast %103 : f32 to vector<8x8xf32>
    %105 = arith.mulf %104, %94 : vector<8x8xf32>
    %106 = arith.addf %84, %105 : vector<8x8xf32>
    %c3_47 = arith.constant 3 : index
    %c3_48 = arith.constant 3 : index
    %107 = memref.load %arg5[%c3_47, %c3_48] : memref<16x4xf32, #tpu.memory_space<smem>>
    %108 = vector.broadcast %107 : f32 to vector<8x8xf32>
    %109 = arith.mulf %108, %94 : vector<8x8xf32>
    %110 = arith.addf %88, %109 : vector<8x8xf32>
    %111 = vector.extract_strided_slice %6 {offsets = [0, 4], sizes = [8, 1], strides = [1, 1]} : vector<8x16xf32> to vector<8x1xf32>
    %112 = vector.extract_strided_slice %8 {offsets = [4, 0], sizes = [1, 8], strides = [1, 1]} : vector<16x8xf32> to vector<1x8xf32>
    %113 = vector.broadcast %111 : vector<8x1xf32> to vector<8x8xf32>
    %114 = vector.broadcast %112 : vector<1x8xf32> to vector<8x8xf32>
    %115 = arith.addf %113, %114 : vector<8x8xf32>
    %116 = math.tanh %115 : vector<8x8xf32>
    %c4 = arith.constant 4 : index
    %c0_49 = arith.constant 0 : index
    %117 = memref.load %arg5[%c4, %c0_49] : memref<16x4xf32, #tpu.memory_space<smem>>
    %118 = vector.broadcast %117 : f32 to vector<8x8xf32>
    %119 = arith.mulf %118, %116 : vector<8x8xf32>
    %120 = arith.addf %98, %119 : vector<8x8xf32>
    %c4_50 = arith.constant 4 : index
    %c1_51 = arith.constant 1 : index
    %121 = memref.load %arg5[%c4_50, %c1_51] : memref<16x4xf32, #tpu.memory_space<smem>>
    %122 = vector.broadcast %121 : f32 to vector<8x8xf32>
    %123 = arith.mulf %122, %116 : vector<8x8xf32>
    %124 = arith.addf %102, %123 : vector<8x8xf32>
    %c4_52 = arith.constant 4 : index
    %c2_53 = arith.constant 2 : index
    %125 = memref.load %arg5[%c4_52, %c2_53] : memref<16x4xf32, #tpu.memory_space<smem>>
    %126 = vector.broadcast %125 : f32 to vector<8x8xf32>
    %127 = arith.mulf %126, %116 : vector<8x8xf32>
    %128 = arith.addf %106, %127 : vector<8x8xf32>
    %c4_54 = arith.constant 4 : index
    %c3_55 = arith.constant 3 : index
    %129 = memref.load %arg5[%c4_54, %c3_55] : memref<16x4xf32, #tpu.memory_space<smem>>
    %130 = vector.broadcast %129 : f32 to vector<8x8xf32>
    %131 = arith.mulf %130, %116 : vector<8x8xf32>
    %132 = arith.addf %110, %131 : vector<8x8xf32>
    %133 = vector.extract_strided_slice %6 {offsets = [0, 5], sizes = [8, 1], strides = [1, 1]} : vector<8x16xf32> to vector<8x1xf32>
    %134 = vector.extract_strided_slice %8 {offsets = [5, 0], sizes = [1, 8], strides = [1, 1]} : vector<16x8xf32> to vector<1x8xf32>
    %135 = vector.broadcast %133 : vector<8x1xf32> to vector<8x8xf32>
    %136 = vector.broadcast %134 : vector<1x8xf32> to vector<8x8xf32>
    %137 = arith.addf %135, %136 : vector<8x8xf32>
    %138 = math.tanh %137 : vector<8x8xf32>
    %c5 = arith.constant 5 : index
    %c0_56 = arith.constant 0 : index
    %139 = memref.load %arg5[%c5, %c0_56] : memref<16x4xf32, #tpu.memory_space<smem>>
    %140 = vector.broadcast %139 : f32 to vector<8x8xf32>
    %141 = arith.mulf %140, %138 : vector<8x8xf32>
    %142 = arith.addf %120, %141 : vector<8x8xf32>
    %c5_57 = arith.constant 5 : index
    %c1_58 = arith.constant 1 : index
    %143 = memref.load %arg5[%c5_57, %c1_58] : memref<16x4xf32, #tpu.memory_space<smem>>
    %144 = vector.broadcast %143 : f32 to vector<8x8xf32>
    %145 = arith.mulf %144, %138 : vector<8x8xf32>
    %146 = arith.addf %124, %145 : vector<8x8xf32>
    %c5_59 = arith.constant 5 : index
    %c2_60 = arith.constant 2 : index
    %147 = memref.load %arg5[%c5_59, %c2_60] : memref<16x4xf32, #tpu.memory_space<smem>>
    %148 = vector.broadcast %147 : f32 to vector<8x8xf32>
    %149 = arith.mulf %148, %138 : vector<8x8xf32>
    %150 = arith.addf %128, %149 : vector<8x8xf32>
    %c5_61 = arith.constant 5 : index
    %c3_62 = arith.constant 3 : index
    %151 = memref.load %arg5[%c5_61, %c3_62] : memref<16x4xf32, #tpu.memory_space<smem>>
    %152 = vector.broadcast %151 : f32 to vector<8x8xf32>
    %153 = arith.mulf %152, %138 : vector<8x8xf32>
    %154 = arith.addf %132, %153 : vector<8x8xf32>
    %155 = vector.extract_strided_slice %6 {offsets = [0, 6], sizes = [8, 1], strides = [1, 1]} : vector<8x16xf32> to vector<8x1xf32>
    %156 = vector.extract_strided_slice %8 {offsets = [6, 0], sizes = [1, 8], strides = [1, 1]} : vector<16x8xf32> to vector<1x8xf32>
    %157 = vector.broadcast %155 : vector<8x1xf32> to vector<8x8xf32>
    %158 = vector.broadcast %156 : vector<1x8xf32> to vector<8x8xf32>
    %159 = arith.addf %157, %158 : vector<8x8xf32>
    %160 = math.tanh %159 : vector<8x8xf32>
    %c6 = arith.constant 6 : index
    %c0_63 = arith.constant 0 : index
    %161 = memref.load %arg5[%c6, %c0_63] : memref<16x4xf32, #tpu.memory_space<smem>>
    %162 = vector.broadcast %161 : f32 to vector<8x8xf32>
    %163 = arith.mulf %162, %160 : vector<8x8xf32>
    %164 = arith.addf %142, %163 : vector<8x8xf32>
    %c6_64 = arith.constant 6 : index
    %c1_65 = arith.constant 1 : index
    %165 = memref.load %arg5[%c6_64, %c1_65] : memref<16x4xf32, #tpu.memory_space<smem>>
    %166 = vector.broadcast %165 : f32 to vector<8x8xf32>
    %167 = arith.mulf %166, %160 : vector<8x8xf32>
    %168 = arith.addf %146, %167 : vector<8x8xf32>
    %c6_66 = arith.constant 6 : index
    %c2_67 = arith.constant 2 : index
    %169 = memref.load %arg5[%c6_66, %c2_67] : memref<16x4xf32, #tpu.memory_space<smem>>
    %170 = vector.broadcast %169 : f32 to vector<8x8xf32>
    %171 = arith.mulf %170, %160 : vector<8x8xf32>
    %172 = arith.addf %150, %171 : vector<8x8xf32>
    %c6_68 = arith.constant 6 : index
    %c3_69 = arith.constant 3 : index
    %173 = memref.load %arg5[%c6_68, %c3_69] : memref<16x4xf32, #tpu.memory_space<smem>>
    %174 = vector.broadcast %173 : f32 to vector<8x8xf32>
    %175 = arith.mulf %174, %160 : vector<8x8xf32>
    %176 = arith.addf %154, %175 : vector<8x8xf32>
    %177 = vector.extract_strided_slice %6 {offsets = [0, 7], sizes = [8, 1], strides = [1, 1]} : vector<8x16xf32> to vector<8x1xf32>
    %178 = vector.extract_strided_slice %8 {offsets = [7, 0], sizes = [1, 8], strides = [1, 1]} : vector<16x8xf32> to vector<1x8xf32>
    %179 = vector.broadcast %177 : vector<8x1xf32> to vector<8x8xf32>
    %180 = vector.broadcast %178 : vector<1x8xf32> to vector<8x8xf32>
    %181 = arith.addf %179, %180 : vector<8x8xf32>
    %182 = math.tanh %181 : vector<8x8xf32>
    %c7 = arith.constant 7 : index
    %c0_70 = arith.constant 0 : index
    %183 = memref.load %arg5[%c7, %c0_70] : memref<16x4xf32, #tpu.memory_space<smem>>
    %184 = vector.broadcast %183 : f32 to vector<8x8xf32>
    %185 = arith.mulf %184, %182 : vector<8x8xf32>
    %186 = arith.addf %164, %185 : vector<8x8xf32>
    %c7_71 = arith.constant 7 : index
    %c1_72 = arith.constant 1 : index
    %187 = memref.load %arg5[%c7_71, %c1_72] : memref<16x4xf32, #tpu.memory_space<smem>>
    %188 = vector.broadcast %187 : f32 to vector<8x8xf32>
    %189 = arith.mulf %188, %182 : vector<8x8xf32>
    %190 = arith.addf %168, %189 : vector<8x8xf32>
    %c7_73 = arith.constant 7 : index
    %c2_74 = arith.constant 2 : index
    %191 = memref.load %arg5[%c7_73, %c2_74] : memref<16x4xf32, #tpu.memory_space<smem>>
    %192 = vector.broadcast %191 : f32 to vector<8x8xf32>
    %193 = arith.mulf %192, %182 : vector<8x8xf32>
    %194 = arith.addf %172, %193 : vector<8x8xf32>
    %c7_75 = arith.constant 7 : index
    %c3_76 = arith.constant 3 : index
    %195 = memref.load %arg5[%c7_75, %c3_76] : memref<16x4xf32, #tpu.memory_space<smem>>
    %196 = vector.broadcast %195 : f32 to vector<8x8xf32>
    %197 = arith.mulf %196, %182 : vector<8x8xf32>
    %198 = arith.addf %176, %197 : vector<8x8xf32>
    %199 = vector.extract_strided_slice %6 {offsets = [0, 8], sizes = [8, 1], strides = [1, 1]} : vector<8x16xf32> to vector<8x1xf32>
    %200 = vector.extract_strided_slice %8 {offsets = [8, 0], sizes = [1, 8], strides = [1, 1]} : vector<16x8xf32> to vector<1x8xf32>
    %201 = vector.broadcast %199 : vector<8x1xf32> to vector<8x8xf32>
    %202 = vector.broadcast %200 : vector<1x8xf32> to vector<8x8xf32>
    %203 = arith.addf %201, %202 : vector<8x8xf32>
    %204 = math.tanh %203 : vector<8x8xf32>
    %c8 = arith.constant 8 : index
    %c0_77 = arith.constant 0 : index
    %205 = memref.load %arg5[%c8, %c0_77] : memref<16x4xf32, #tpu.memory_space<smem>>
    %206 = vector.broadcast %205 : f32 to vector<8x8xf32>
    %207 = arith.mulf %206, %204 : vector<8x8xf32>
    %208 = arith.addf %186, %207 : vector<8x8xf32>
    %c8_78 = arith.constant 8 : index
    %c1_79 = arith.constant 1 : index
    %209 = memref.load %arg5[%c8_78, %c1_79] : memref<16x4xf32, #tpu.memory_space<smem>>
    %210 = vector.broadcast %209 : f32 to vector<8x8xf32>
    %211 = arith.mulf %210, %204 : vector<8x8xf32>
    %212 = arith.addf %190, %211 : vector<8x8xf32>
    %c8_80 = arith.constant 8 : index
    %c2_81 = arith.constant 2 : index
    %213 = memref.load %arg5[%c8_80, %c2_81] : memref<16x4xf32, #tpu.memory_space<smem>>
    %214 = vector.broadcast %213 : f32 to vector<8x8xf32>
    %215 = arith.mulf %214, %204 : vector<8x8xf32>
    %216 = arith.addf %194, %215 : vector<8x8xf32>
    %c8_82 = arith.constant 8 : index
    %c3_83 = arith.constant 3 : index
    %217 = memref.load %arg5[%c8_82, %c3_83] : memref<16x4xf32, #tpu.memory_space<smem>>
    %218 = vector.broadcast %217 : f32 to vector<8x8xf32>
    %219 = arith.mulf %218, %204 : vector<8x8xf32>
    %220 = arith.addf %198, %219 : vector<8x8xf32>
    %221 = vector.extract_strided_slice %6 {offsets = [0, 9], sizes = [8, 1], strides = [1, 1]} : vector<8x16xf32> to vector<8x1xf32>
    %222 = vector.extract_strided_slice %8 {offsets = [9, 0], sizes = [1, 8], strides = [1, 1]} : vector<16x8xf32> to vector<1x8xf32>
    %223 = vector.broadcast %221 : vector<8x1xf32> to vector<8x8xf32>
    %224 = vector.broadcast %222 : vector<1x8xf32> to vector<8x8xf32>
    %225 = arith.addf %223, %224 : vector<8x8xf32>
    %226 = math.tanh %225 : vector<8x8xf32>
    %c9 = arith.constant 9 : index
    %c0_84 = arith.constant 0 : index
    %227 = memref.load %arg5[%c9, %c0_84] : memref<16x4xf32, #tpu.memory_space<smem>>
    %228 = vector.broadcast %227 : f32 to vector<8x8xf32>
    %229 = arith.mulf %228, %226 : vector<8x8xf32>
    %230 = arith.addf %208, %229 : vector<8x8xf32>
    %c9_85 = arith.constant 9 : index
    %c1_86 = arith.constant 1 : index
    %231 = memref.load %arg5[%c9_85, %c1_86] : memref<16x4xf32, #tpu.memory_space<smem>>
    %232 = vector.broadcast %231 : f32 to vector<8x8xf32>
    %233 = arith.mulf %232, %226 : vector<8x8xf32>
    %234 = arith.addf %212, %233 : vector<8x8xf32>
    %c9_87 = arith.constant 9 : index
    %c2_88 = arith.constant 2 : index
    %235 = memref.load %arg5[%c9_87, %c2_88] : memref<16x4xf32, #tpu.memory_space<smem>>
    %236 = vector.broadcast %235 : f32 to vector<8x8xf32>
    %237 = arith.mulf %236, %226 : vector<8x8xf32>
    %238 = arith.addf %216, %237 : vector<8x8xf32>
    %c9_89 = arith.constant 9 : index
    %c3_90 = arith.constant 3 : index
    %239 = memref.load %arg5[%c9_89, %c3_90] : memref<16x4xf32, #tpu.memory_space<smem>>
    %240 = vector.broadcast %239 : f32 to vector<8x8xf32>
    %241 = arith.mulf %240, %226 : vector<8x8xf32>
    %242 = arith.addf %220, %241 : vector<8x8xf32>
    %243 = vector.extract_strided_slice %6 {offsets = [0, 10], sizes = [8, 1], strides = [1, 1]} : vector<8x16xf32> to vector<8x1xf32>
    %244 = vector.extract_strided_slice %8 {offsets = [10, 0], sizes = [1, 8], strides = [1, 1]} : vector<16x8xf32> to vector<1x8xf32>
    %245 = vector.broadcast %243 : vector<8x1xf32> to vector<8x8xf32>
    %246 = vector.broadcast %244 : vector<1x8xf32> to vector<8x8xf32>
    %247 = arith.addf %245, %246 : vector<8x8xf32>
    %248 = math.tanh %247 : vector<8x8xf32>
    %c10 = arith.constant 10 : index
    %c0_91 = arith.constant 0 : index
    %249 = memref.load %arg5[%c10, %c0_91] : memref<16x4xf32, #tpu.memory_space<smem>>
    %250 = vector.broadcast %249 : f32 to vector<8x8xf32>
    %251 = arith.mulf %250, %248 : vector<8x8xf32>
    %252 = arith.addf %230, %251 : vector<8x8xf32>
    %c10_92 = arith.constant 10 : index
    %c1_93 = arith.constant 1 : index
    %253 = memref.load %arg5[%c10_92, %c1_93] : memref<16x4xf32, #tpu.memory_space<smem>>
    %254 = vector.broadcast %253 : f32 to vector<8x8xf32>
    %255 = arith.mulf %254, %248 : vector<8x8xf32>
    %256 = arith.addf %234, %255 : vector<8x8xf32>
    %c10_94 = arith.constant 10 : index
    %c2_95 = arith.constant 2 : index
    %257 = memref.load %arg5[%c10_94, %c2_95] : memref<16x4xf32, #tpu.memory_space<smem>>
    %258 = vector.broadcast %257 : f32 to vector<8x8xf32>
    %259 = arith.mulf %258, %248 : vector<8x8xf32>
    %260 = arith.addf %238, %259 : vector<8x8xf32>
    %c10_96 = arith.constant 10 : index
    %c3_97 = arith.constant 3 : index
    %261 = memref.load %arg5[%c10_96, %c3_97] : memref<16x4xf32, #tpu.memory_space<smem>>
    %262 = vector.broadcast %261 : f32 to vector<8x8xf32>
    %263 = arith.mulf %262, %248 : vector<8x8xf32>
    %264 = arith.addf %242, %263 : vector<8x8xf32>
    %265 = vector.extract_strided_slice %6 {offsets = [0, 11], sizes = [8, 1], strides = [1, 1]} : vector<8x16xf32> to vector<8x1xf32>
    %266 = vector.extract_strided_slice %8 {offsets = [11, 0], sizes = [1, 8], strides = [1, 1]} : vector<16x8xf32> to vector<1x8xf32>
    %267 = vector.broadcast %265 : vector<8x1xf32> to vector<8x8xf32>
    %268 = vector.broadcast %266 : vector<1x8xf32> to vector<8x8xf32>
    %269 = arith.addf %267, %268 : vector<8x8xf32>
    %270 = math.tanh %269 : vector<8x8xf32>
    %c11 = arith.constant 11 : index
    %c0_98 = arith.constant 0 : index
    %271 = memref.load %arg5[%c11, %c0_98] : memref<16x4xf32, #tpu.memory_space<smem>>
    %272 = vector.broadcast %271 : f32 to vector<8x8xf32>
    %273 = arith.mulf %272, %270 : vector<8x8xf32>
    %274 = arith.addf %252, %273 : vector<8x8xf32>
    %c11_99 = arith.constant 11 : index
    %c1_100 = arith.constant 1 : index
    %275 = memref.load %arg5[%c11_99, %c1_100] : memref<16x4xf32, #tpu.memory_space<smem>>
    %276 = vector.broadcast %275 : f32 to vector<8x8xf32>
    %277 = arith.mulf %276, %270 : vector<8x8xf32>
    %278 = arith.addf %256, %277 : vector<8x8xf32>
    %c11_101 = arith.constant 11 : index
    %c2_102 = arith.constant 2 : index
    %279 = memref.load %arg5[%c11_101, %c2_102] : memref<16x4xf32, #tpu.memory_space<smem>>
    %280 = vector.broadcast %279 : f32 to vector<8x8xf32>
    %281 = arith.mulf %280, %270 : vector<8x8xf32>
    %282 = arith.addf %260, %281 : vector<8x8xf32>
    %c11_103 = arith.constant 11 : index
    %c3_104 = arith.constant 3 : index
    %283 = memref.load %arg5[%c11_103, %c3_104] : memref<16x4xf32, #tpu.memory_space<smem>>
    %284 = vector.broadcast %283 : f32 to vector<8x8xf32>
    %285 = arith.mulf %284, %270 : vector<8x8xf32>
    %286 = arith.addf %264, %285 : vector<8x8xf32>
    %287 = vector.extract_strided_slice %6 {offsets = [0, 12], sizes = [8, 1], strides = [1, 1]} : vector<8x16xf32> to vector<8x1xf32>
    %288 = vector.extract_strided_slice %8 {offsets = [12, 0], sizes = [1, 8], strides = [1, 1]} : vector<16x8xf32> to vector<1x8xf32>
    %289 = vector.broadcast %287 : vector<8x1xf32> to vector<8x8xf32>
    %290 = vector.broadcast %288 : vector<1x8xf32> to vector<8x8xf32>
    %291 = arith.addf %289, %290 : vector<8x8xf32>
    %292 = math.tanh %291 : vector<8x8xf32>
    %c12 = arith.constant 12 : index
    %c0_105 = arith.constant 0 : index
    %293 = memref.load %arg5[%c12, %c0_105] : memref<16x4xf32, #tpu.memory_space<smem>>
    %294 = vector.broadcast %293 : f32 to vector<8x8xf32>
    %295 = arith.mulf %294, %292 : vector<8x8xf32>
    %296 = arith.addf %274, %295 : vector<8x8xf32>
    %c12_106 = arith.constant 12 : index
    %c1_107 = arith.constant 1 : index
    %297 = memref.load %arg5[%c12_106, %c1_107] : memref<16x4xf32, #tpu.memory_space<smem>>
    %298 = vector.broadcast %297 : f32 to vector<8x8xf32>
    %299 = arith.mulf %298, %292 : vector<8x8xf32>
    %300 = arith.addf %278, %299 : vector<8x8xf32>
    %c12_108 = arith.constant 12 : index
    %c2_109 = arith.constant 2 : index
    %301 = memref.load %arg5[%c12_108, %c2_109] : memref<16x4xf32, #tpu.memory_space<smem>>
    %302 = vector.broadcast %301 : f32 to vector<8x8xf32>
    %303 = arith.mulf %302, %292 : vector<8x8xf32>
    %304 = arith.addf %282, %303 : vector<8x8xf32>
    %c12_110 = arith.constant 12 : index
    %c3_111 = arith.constant 3 : index
    %305 = memref.load %arg5[%c12_110, %c3_111] : memref<16x4xf32, #tpu.memory_space<smem>>
    %306 = vector.broadcast %305 : f32 to vector<8x8xf32>
    %307 = arith.mulf %306, %292 : vector<8x8xf32>
    %308 = arith.addf %286, %307 : vector<8x8xf32>
    %309 = vector.extract_strided_slice %6 {offsets = [0, 13], sizes = [8, 1], strides = [1, 1]} : vector<8x16xf32> to vector<8x1xf32>
    %310 = vector.extract_strided_slice %8 {offsets = [13, 0], sizes = [1, 8], strides = [1, 1]} : vector<16x8xf32> to vector<1x8xf32>
    %311 = vector.broadcast %309 : vector<8x1xf32> to vector<8x8xf32>
    %312 = vector.broadcast %310 : vector<1x8xf32> to vector<8x8xf32>
    %313 = arith.addf %311, %312 : vector<8x8xf32>
    %314 = math.tanh %313 : vector<8x8xf32>
    %c13 = arith.constant 13 : index
    %c0_112 = arith.constant 0 : index
    %315 = memref.load %arg5[%c13, %c0_112] : memref<16x4xf32, #tpu.memory_space<smem>>
    %316 = vector.broadcast %315 : f32 to vector<8x8xf32>
    %317 = arith.mulf %316, %314 : vector<8x8xf32>
    %318 = arith.addf %296, %317 : vector<8x8xf32>
    %c13_113 = arith.constant 13 : index
    %c1_114 = arith.constant 1 : index
    %319 = memref.load %arg5[%c13_113, %c1_114] : memref<16x4xf32, #tpu.memory_space<smem>>
    %320 = vector.broadcast %319 : f32 to vector<8x8xf32>
    %321 = arith.mulf %320, %314 : vector<8x8xf32>
    %322 = arith.addf %300, %321 : vector<8x8xf32>
    %c13_115 = arith.constant 13 : index
    %c2_116 = arith.constant 2 : index
    %323 = memref.load %arg5[%c13_115, %c2_116] : memref<16x4xf32, #tpu.memory_space<smem>>
    %324 = vector.broadcast %323 : f32 to vector<8x8xf32>
    %325 = arith.mulf %324, %314 : vector<8x8xf32>
    %326 = arith.addf %304, %325 : vector<8x8xf32>
    %c13_117 = arith.constant 13 : index
    %c3_118 = arith.constant 3 : index
    %327 = memref.load %arg5[%c13_117, %c3_118] : memref<16x4xf32, #tpu.memory_space<smem>>
    %328 = vector.broadcast %327 : f32 to vector<8x8xf32>
    %329 = arith.mulf %328, %314 : vector<8x8xf32>
    %330 = arith.addf %308, %329 : vector<8x8xf32>
    %331 = vector.extract_strided_slice %6 {offsets = [0, 14], sizes = [8, 1], strides = [1, 1]} : vector<8x16xf32> to vector<8x1xf32>
    %332 = vector.extract_strided_slice %8 {offsets = [14, 0], sizes = [1, 8], strides = [1, 1]} : vector<16x8xf32> to vector<1x8xf32>
    %333 = vector.broadcast %331 : vector<8x1xf32> to vector<8x8xf32>
    %334 = vector.broadcast %332 : vector<1x8xf32> to vector<8x8xf32>
    %335 = arith.addf %333, %334 : vector<8x8xf32>
    %336 = math.tanh %335 : vector<8x8xf32>
    %c14 = arith.constant 14 : index
    %c0_119 = arith.constant 0 : index
    %337 = memref.load %arg5[%c14, %c0_119] : memref<16x4xf32, #tpu.memory_space<smem>>
    %338 = vector.broadcast %337 : f32 to vector<8x8xf32>
    %339 = arith.mulf %338, %336 : vector<8x8xf32>
    %340 = arith.addf %318, %339 : vector<8x8xf32>
    %c14_120 = arith.constant 14 : index
    %c1_121 = arith.constant 1 : index
    %341 = memref.load %arg5[%c14_120, %c1_121] : memref<16x4xf32, #tpu.memory_space<smem>>
    %342 = vector.broadcast %341 : f32 to vector<8x8xf32>
    %343 = arith.mulf %342, %336 : vector<8x8xf32>
    %344 = arith.addf %322, %343 : vector<8x8xf32>
    %c14_122 = arith.constant 14 : index
    %c2_123 = arith.constant 2 : index
    %345 = memref.load %arg5[%c14_122, %c2_123] : memref<16x4xf32, #tpu.memory_space<smem>>
    %346 = vector.broadcast %345 : f32 to vector<8x8xf32>
    %347 = arith.mulf %346, %336 : vector<8x8xf32>
    %348 = arith.addf %326, %347 : vector<8x8xf32>
    %c14_124 = arith.constant 14 : index
    %c3_125 = arith.constant 3 : index
    %349 = memref.load %arg5[%c14_124, %c3_125] : memref<16x4xf32, #tpu.memory_space<smem>>
    %350 = vector.broadcast %349 : f32 to vector<8x8xf32>
    %351 = arith.mulf %350, %336 : vector<8x8xf32>
    %352 = arith.addf %330, %351 : vector<8x8xf32>
    %353 = vector.extract_strided_slice %6 {offsets = [0, 15], sizes = [8, 1], strides = [1, 1]} : vector<8x16xf32> to vector<8x1xf32>
    %354 = vector.extract_strided_slice %8 {offsets = [15, 0], sizes = [1, 8], strides = [1, 1]} : vector<16x8xf32> to vector<1x8xf32>
    %355 = vector.broadcast %353 : vector<8x1xf32> to vector<8x8xf32>
    %356 = vector.broadcast %354 : vector<1x8xf32> to vector<8x8xf32>
    %357 = arith.addf %355, %356 : vector<8x8xf32>
    %358 = math.tanh %357 : vector<8x8xf32>
    %c15 = arith.constant 15 : index
    %c0_126 = arith.constant 0 : index
    %359 = memref.load %arg5[%c15, %c0_126] : memref<16x4xf32, #tpu.memory_space<smem>>
    %360 = vector.broadcast %359 : f32 to vector<8x8xf32>
    %361 = arith.mulf %360, %358 : vector<8x8xf32>
    %362 = arith.addf %340, %361 : vector<8x8xf32>
    %c15_127 = arith.constant 15 : index
    %c1_128 = arith.constant 1 : index
    %363 = memref.load %arg5[%c15_127, %c1_128] : memref<16x4xf32, #tpu.memory_space<smem>>
    %364 = vector.broadcast %363 : f32 to vector<8x8xf32>
    %365 = arith.mulf %364, %358 : vector<8x8xf32>
    %366 = arith.addf %344, %365 : vector<8x8xf32>
    %c15_129 = arith.constant 15 : index
    %c2_130 = arith.constant 2 : index
    %367 = memref.load %arg5[%c15_129, %c2_130] : memref<16x4xf32, #tpu.memory_space<smem>>
    %368 = vector.broadcast %367 : f32 to vector<8x8xf32>
    %369 = arith.mulf %368, %358 : vector<8x8xf32>
    %370 = arith.addf %348, %369 : vector<8x8xf32>
    %c15_131 = arith.constant 15 : index
    %c3_132 = arith.constant 3 : index
    %371 = memref.load %arg5[%c15_131, %c3_132] : memref<16x4xf32, #tpu.memory_space<smem>>
    %372 = vector.broadcast %371 : f32 to vector<8x8xf32>
    %373 = arith.mulf %372, %358 : vector<8x8xf32>
    %374 = arith.addf %352, %373 : vector<8x8xf32>
    %375 = vector.extract_strided_slice %11 {offsets = [0, 0, 0], sizes = [8, 1, 8], strides = [1, 1, 1]} : vector<8x4x8xf32> to vector<8x1x8xf32>
    %376 = vector.shape_cast %375 : vector<8x1x8xf32> to vector<8x8xf32>
    %cst_133 = arith.constant 0.000000e+00 : f32
    %377 = vector.broadcast %cst_133 : f32 to vector<8x8xf32>
    %378 = arith.maximumf %362, %377 : vector<8x8xf32>
    %379 = arith.mulf %362, %376 : vector<8x8xf32>
    %380 = arith.subf %378, %379 : vector<8x8xf32>
    %381 = math.absf %362 : vector<8x8xf32>
    %cst_134 = arith.constant 0.000000e+00 : f32
    %382 = vector.broadcast %cst_134 : f32 to vector<8x8xf32>
    %383 = arith.subf %382, %381 : vector<8x8xf32>
    %384 = math.exp %383 : vector<8x8xf32>
    %385 = math.log1p %384 : vector<8x8xf32>
    %386 = arith.addf %380, %385 : vector<8x8xf32>
    %387 = arith.mulf %386, %18 : vector<8x8xf32>
    %388 = vector.shape_cast %387 : vector<8x8xf32> to vector<1x8x8xf32>
    %cst_135 = arith.constant dense<0.000000e+00> : vector<1xf32>
    %389 = vector.multi_reduction <add>, %388, %cst_135 [1, 2] : vector<1x8x8xf32> to vector<1xf32>
    %390 = vector.shape_cast %389 : vector<1xf32> to vector<1x1x1xf32>
    %391 = vector.extract %390[0, 0, 0] : f32 from vector<1x1x1xf32>
    %cst_136 = arith.constant 0.000000e+00 : f32
    %392 = arith.addf %cst_136, %391 : f32
    %393 = vector.extract_strided_slice %11 {offsets = [0, 1, 0], sizes = [8, 1, 8], strides = [1, 1, 1]} : vector<8x4x8xf32> to vector<8x1x8xf32>
    %394 = vector.shape_cast %393 : vector<8x1x8xf32> to vector<8x8xf32>
    %cst_137 = arith.constant 0.000000e+00 : f32
    %395 = vector.broadcast %cst_137 : f32 to vector<8x8xf32>
    %396 = arith.maximumf %366, %395 : vector<8x8xf32>
    %397 = arith.mulf %366, %394 : vector<8x8xf32>
    %398 = arith.subf %396, %397 : vector<8x8xf32>
    %399 = math.absf %366 : vector<8x8xf32>
    %cst_138 = arith.constant 0.000000e+00 : f32
    %400 = vector.broadcast %cst_138 : f32 to vector<8x8xf32>
    %401 = arith.subf %400, %399 : vector<8x8xf32>
    %402 = math.exp %401 : vector<8x8xf32>
    %403 = math.log1p %402 : vector<8x8xf32>
    %404 = arith.addf %398, %403 : vector<8x8xf32>
    %405 = arith.mulf %404, %18 : vector<8x8xf32>
    %406 = vector.shape_cast %405 : vector<8x8xf32> to vector<1x8x8xf32>
    %cst_139 = arith.constant dense<0.000000e+00> : vector<1xf32>
    %407 = vector.multi_reduction <add>, %406, %cst_139 [1, 2] : vector<1x8x8xf32> to vector<1xf32>
    %408 = vector.shape_cast %407 : vector<1xf32> to vector<1x1x1xf32>
    %409 = vector.extract %408[0, 0, 0] : f32 from vector<1x1x1xf32>
    %410 = arith.addf %392, %409 : f32
    %411 = vector.extract_strided_slice %11 {offsets = [0, 2, 0], sizes = [8, 1, 8], strides = [1, 1, 1]} : vector<8x4x8xf32> to vector<8x1x8xf32>
    %412 = vector.shape_cast %411 : vector<8x1x8xf32> to vector<8x8xf32>
    %cst_140 = arith.constant 0.000000e+00 : f32
    %413 = vector.broadcast %cst_140 : f32 to vector<8x8xf32>
    %414 = arith.maximumf %370, %413 : vector<8x8xf32>
    %415 = arith.mulf %370, %412 : vector<8x8xf32>
    %416 = arith.subf %414, %415 : vector<8x8xf32>
    %417 = math.absf %370 : vector<8x8xf32>
    %cst_141 = arith.constant 0.000000e+00 : f32
    %418 = vector.broadcast %cst_141 : f32 to vector<8x8xf32>
    %419 = arith.subf %418, %417 : vector<8x8xf32>
    %420 = math.exp %419 : vector<8x8xf32>
    %421 = math.log1p %420 : vector<8x8xf32>
    %422 = arith.addf %416, %421 : vector<8x8xf32>
    %423 = arith.mulf %422, %18 : vector<8x8xf32>
    %424 = vector.shape_cast %423 : vector<8x8xf32> to vector<1x8x8xf32>
    %cst_142 = arith.constant dense<0.000000e+00> : vector<1xf32>
    %425 = vector.multi_reduction <add>, %424, %cst_142 [1, 2] : vector<1x8x8xf32> to vector<1xf32>
    %426 = vector.shape_cast %425 : vector<1xf32> to vector<1x1x1xf32>
    %427 = vector.extract %426[0, 0, 0] : f32 from vector<1x1x1xf32>
    %428 = arith.addf %410, %427 : f32
    %429 = vector.extract_strided_slice %11 {offsets = [0, 3, 0], sizes = [8, 1, 8], strides = [1, 1, 1]} : vector<8x4x8xf32> to vector<8x1x8xf32>
    %430 = vector.shape_cast %429 : vector<8x1x8xf32> to vector<8x8xf32>
    %cst_143 = arith.constant 0.000000e+00 : f32
    %431 = vector.broadcast %cst_143 : f32 to vector<8x8xf32>
    %432 = arith.maximumf %374, %431 : vector<8x8xf32>
    %433 = arith.mulf %374, %430 : vector<8x8xf32>
    %434 = arith.subf %432, %433 : vector<8x8xf32>
    %435 = math.absf %374 : vector<8x8xf32>
    %cst_144 = arith.constant 0.000000e+00 : f32
    %436 = vector.broadcast %cst_144 : f32 to vector<8x8xf32>
    %437 = arith.subf %436, %435 : vector<8x8xf32>
    %438 = math.exp %437 : vector<8x8xf32>
    %439 = math.log1p %438 : vector<8x8xf32>
    %440 = arith.addf %434, %439 : vector<8x8xf32>
    %441 = arith.mulf %440, %18 : vector<8x8xf32>
    %442 = vector.shape_cast %441 : vector<8x8xf32> to vector<1x8x8xf32>
    %cst_145 = arith.constant dense<0.000000e+00> : vector<1xf32>
    %443 = vector.multi_reduction <add>, %442, %cst_145 [1, 2] : vector<1x8x8xf32> to vector<1xf32>
    %444 = vector.shape_cast %443 : vector<1xf32> to vector<1x1x1xf32>
    %445 = vector.extract %444[0, 0, 0] : f32 from vector<1x1x1xf32>
    %446 = arith.addf %428, %445 : f32
    %c0_146 = arith.constant 0 : index
    %c0_147 = arith.constant 0 : index
    %c0_148 = arith.constant 0 : index
    %447 = vector.load %arg9[%c0_146, %c0_147, %c0_148] : memref<1x1x128xf32, #tpu.memory_space<vmem>>, vector<1x1x128xf32>
    %448 = vector.broadcast %446 : f32 to vector<1x1x128xf32>
    %449 = arith.addf %447, %448 : vector<1x1x128xf32>
    %c0_149 = arith.constant 0 : index
    %c0_150 = arith.constant 0 : index
    %c0_151 = arith.constant 0 : index
    %450 = vector.load %arg9[%c0_149, %c0_150, %c0_151] : memref<1x1x128xf32, #tpu.memory_space<vmem>>, vector<1x1x128xf32>
    tpu.vector_store %arg9[%c0_149, %c0_150, %c0_151], %449 {strides = array<i32>} : memref<1x1x128xf32, #tpu.memory_space<vmem>>, vector<1x1x128xf32>,
    return
  }
  func.func @transform_0(%arg0: i32, %arg1: i32, %arg2: i32) -> (i32, i32, i32) {
    %c0_i32 = arith.constant 0 : i32
    %c0_i32_0 = arith.constant 0 : i32
    return %arg0, %arg1, %c0_i32 : i32, i32, i32
  }
  func.func @transform_1(%arg0: i32, %arg1: i32, %arg2: i32) -> (i32, i32, i32) {
    %c0_i32 = arith.constant 0 : i32
    %c0_i32_0 = arith.constant 0 : i32
    return %arg0, %c0_i32, %arg2 : i32, i32, i32
  }
  func.func @transform_2(%arg0: i32, %arg1: i32, %arg2: i32) -> (i32, i32) {
    %c0_i32 = arith.constant 0 : i32
    %c0_i32_0 = arith.constant 0 : i32
    %c0_i32_1 = arith.constant 0 : i32
    return %c0_i32, %c0_i32_0 : i32, i32
  }
  func.func @transform_3(%arg0: i32, %arg1: i32, %arg2: i32) -> (i32, i32, i32, i32) {
    %c0_i32 = arith.constant 0 : i32
    %c0_i32_0 = arith.constant 0 : i32
    return %arg0, %arg1, %c0_i32, %arg2 : i32, i32, i32, i32
  }
  func.func @transform_4(%arg0: i32, %arg1: i32, %arg2: i32) -> (i32, i32, i32) {
    %c0_i32 = arith.constant 0 : i32
    %c0_i32_0 = arith.constant 0 : i32
    return %arg0, %arg1, %c0_i32 : i32, i32, i32
  }
  func.func @transform_5(%arg0: i32, %arg1: i32, %arg2: i32) -> (i32, i32, i32) {
    %c0_i32 = arith.constant 0 : i32
    %c0_i32_0 = arith.constant 0 : i32
    return %arg0, %c0_i32, %arg2 : i32, i32, i32
  }
  func.func @transform_6(%arg0: i32, %arg1: i32, %arg2: i32) -> (i32, i32, i32) {
    %c0_i32 = arith.constant 0 : i32
    %c0_i32_0 = arith.constant 0 : i32
    %c0_i32_1 = arith.constant 0 : i32
    return %arg0, %c0_i32, %c0_i32_0 : i32, i32, i32
  }
}

</mosaic_0001>

<bundles_post_ra>
// kernel: forward_train.5
= control target key start
LH: loop header
LB: loop body
LE: loop exit
PB: predicated region body
PF: predicated region fallthrough
CT: control target
= control target key end

     0   :  { %vm42_vm0 = vcmask 261120   ;;  %vm62_vm1 = vcmask 523264   ;;  %s128_s1 = inlined_call_operand.vmem [shape: bf16[32,64], index: 1, kind: input, shape index: {}]   ;;  %s129_s2 = inlined_call_operand.vmem [shape: f32[1,64], index: 2, kind: input, shape index: {}]   ;;  %s130_s0 = inlined_call_operand.vmem [shape: bf16[16,32], index: 0, kind: input, shape index: {}]   ;;  %s131_s3 = inlined_call_operand.vmem [shape: f32[16,64], index: 3, kind: output, shape index: {}]  }
   0x1   :  { %v84_v0 = vld [vmem:[%s128_s1 + $0x8] sm:$0xff]  ;;  %v83_v1 = vld [vmem:[%s128_s1] sm:$0xff] }
   0x2   :  { %52 = vmatpush.bf16.msra.mxu0 %v84_v0  ;;  %v82_v2 = vld [vmem:[%s130_s0] sm:$0xff] }
   0x3   :  { %v85_v3 = vld [vmem:[%s129_s2] ss:$0 sm:$0xff] }
   0x6   :  { %53 = vmatpush.bf16.msra.mxu0 %v83_v1 }
   0x9   :  { %81 = vmatmul.msk.bf16.vlgmr.msra.gmra.mxu0 %vm42_vm0, %v82_v2 }
  0x86   :  { %v55_v4 = vpop.f32.mrf.mxu0 }
  0x87   :  { %v56_v5 = vadd.f32 %v85_v3, %v55_v4 }
  0x89   :  { %86 = vtanh.f32 %v56_v5 }
  0x8e   :  { %v57_v6 = vpop.f32.mrf.mxu0 }
  0x8f   :  { %v87_v7 = vpop.eup %86  ;;  %v58_v8 = vadd.f32 %v85_v3, %v57_v6 }
  0x90   :  { %63 = vst.msk [vmem:[%s131_s3] sm:$0xff] %vm62_vm1, %v87_v7 }
  0x91   :  { %88 = vtanh.f32 %v58_v8 }
  0x97   :  { %v89_v9 = vpop.eup %88 }
  0x98   :  { %64 = vst.msk [vmem:[%s131_s3 + $0x8] sm:$0xff] %vm62_vm1, %v89_v9 }

// kernel: forward_train.6
= control target key start
LH: loop header
LB: loop body
LE: loop exit
PB: predicated region body
PF: predicated region fallthrough
CT: control target
= control target key end

     0   :  { %vm42_vm0 = vcmask 261120   ;;  %vm60_vm1 = vcmask 64512   ;;  %s122_s1 = inlined_call_operand.vmem [shape: bf16[32,8], index: 1, kind: input, shape index: {}]   ;;  %s123_s2 = inlined_call_operand.vmem [shape: f32[1,8], index: 2, kind: input, shape index: {}]   ;;  %s124_s0 = inlined_call_operand.vmem [shape: bf16[16,32], index: 0, kind: input, shape index: {}]   ;;  %s125_s3 = inlined_call_operand.vmem [shape: f32[16,8], index: 3, kind: output, shape index: {}]  }
   0x1   :  { %v82_v0 = vld [vmem:[%s122_s1 + $0x8] sm:$0xff]  ;;  %v81_v1 = vld [vmem:[%s122_s1] sm:$0xff] }
   0x2   :  { %52 = vmatpush.bf16.msra.mxu0 %v82_v0  ;;  %v80_v2 = vld [vmem:[%s124_s0] sm:$0xff] }
   0x3   :  { %v83_v3 = vld [vmem:[%s123_s2] ss:$0 sm:$0xff] }
   0x6   :  { %53 = vmatpush.bf16.msra.mxu0 %v81_v1 }
   0x9   :  { %79 = vmatmul.msk.bf16.vlgmr.msra.gmra.mxu0 %vm42_vm0, %v80_v2 }
  0x86   :  { %v55_v4 = vpop.f32.mrf.mxu0 }
  0x87   :  { %v56_v5 = vadd.f32 %v83_v3, %v55_v4 }
  0x89   :  { %61 = vst.msk [vmem:[%s125_s3] sm:$0xff] %vm60_vm1, %v56_v5 }
  0x8e   :  { %v57_v6 = vpop.f32.mrf.mxu0 }
  0x8f   :  { %v58_v7 = vadd.f32 %v83_v3, %v57_v6 }
  0x91   :  { %62 = vst.msk [vmem:[%s125_s3 + $0x8] sm:$0xff] %vm60_vm1, %v58_v7 }

// kernel: forward_train.7
= control target key start
LH: loop header
LB: loop body
LE: loop exit
PB: predicated region body
PF: predicated region fallthrough
CT: control target
= control target key end

     0   :  { %v182_v1 = vmov 0   ;;  %vm61_vm0 = vcmask 1043456   ;;  %vm57_vm1 = vcmask 326656   ;;  %vm83_vm2 = vcmask 31744   ;;  %s256_s1 = inlined_call_operand.vmem [shape: bf16[40,4], index: 1, kind: input, shape index: {}]   ;;  %s257_s3 = inlined_call_operand.vmem [shape: s32[16,1], index: 3, kind: input, shape index: {}]   ;;  %s258_s2 = inlined_call_operand.vmem [shape: f32[1,4], index: 2, kind: input, shape index: {}]   ;;  %s259_s0 = inlined_call_operand.vmem [shape: bf16[16,40], index: 0, kind: input, shape index: {}]   ;;  %s260_s4 = inlined_call_operand.vmem [shape: f32[16,1], index: 4, kind: input, shape index: {}]   ;;  %s261_s5 = inlined_call_operand.vmem [shape: f32[1,128], index: 5, kind: output, shape index: {}]  }
   0x1   :  { %v32_v0 = vld [vmem:[%s256_s1 + $0x10] sm:$0xf]  ;;  %171 = vset.pattern.permute.xlu1 %v182_v1  ;;  %172 = vset.pattern.permute.xlu0 %v182_v1  ;;  %v79_v3 = vld [vmem:[%s257_s3] sm:$0xff]  ;;  %v166_v6 = vld [vmem:[%s256_s1 + $0x8] sm:$0xff]  ;;  %v108_v14 = vlaneseq  ;;  %vm131_vm5 = vcmask 7168   ;;  %v183_v54 = vmov 0.0  }
   0x2   :  { %v51_v2 = vunpack.c.l.b16 %v32_v0  ;;  %111 = vperm.xlu1 %171, %v79_v3   ;;  %v80_v7 = vld [vmem:[%s257_s3 + $0x8] sm:$0xff]  ;;  %v165_v8 = vld [vmem:[%s256_s1] sm:$0xff]  ;;  %25 = vst [vmem:[%s261_s5] sm:$0x1] %v183_v54 }
   0x3   :  { %v164_v9 = vld [vmem:[%s259_s0] sm:$0xff]  ;;  %v109_v17 = vand.u32 127, %v108_v14  ;;  %v82_v47 = vld [vmem:[%s260_s4 + $0x8] sm:$0xff] }
   0x4   :  { %v54_v4 = vpack.c.b16 %v51_v2, %v51_v2  ;;  %v173_v11 = vld [vmem:[%s258_s2] ss:$0 sm:$0xff] }
   0x5   :  { %v81_v44 = vld [vmem:[%s260_s4] sm:$0xff] }
   0x6   :  { %v63_v5 = vsel %vm61_vm0, %v54_v4, 0 }
   0x7   :  { %70 = vmatpush.bf16.msra.mxu0 %v63_v5 }
   0x9   :  { %v126_v62 = vld [vmem:[%s261_s5] sm:$0x1] }
   0xa   :  { %114 = vperm.xlu1 %171, %v80_v7  }
   0xb   :  { %71 = vmatpush.bf16.msra.mxu0 %v166_v6 }
   0xf   :  { %72 = vmatpush.bf16.msra.mxu0 %v165_v8 }
  0x12   :  { %163 = vmatmul.msk.bf16.vlgmr.msra.gmra.mxu0 %vm57_vm1, %v164_v9 }
  0x74   :  { %v112_v10 = vpop.permute.xlu1 %111 }
  0x75   :  { %vm116_vm4 = vcmp.eq.s32.totalorder %v109_v17, %v112_v10 }
  0x7c   :  { %v115_v16 = vpop.permute.xlu1 %114 }
  0x7d   :  { %vm117_vm3 = vcmp.eq.s32.totalorder %v109_v17, %v115_v16 }
  0x8f   :  { %v74_v12 = vpop.f32.mrf.mxu0 }
  0x90   :  { %v75_v13 = vadd.f32 %v173_v11, %v74_v12 }
  0x92   :  { %v84_v15 = vsel %vm83_vm2, %v75_v13, -inf  ;;  %v118_v23 = vsel %vm116_vm4, %v75_v13, 0.0 }
  0x93   :  { %85 = vmax.xlane.f32.xlu0 %v84_v15  ;;  %v120_v24 = vsel %vm83_vm2, %v118_v23, 0.0 }
  0x97   :  { %v76_v18 = vpop.f32.mrf.mxu0 }
  0x98   :  { %v77_v19 = vadd.f32 %v173_v11, %v76_v18 }
  0x9a   :  { %v87_v20 = vsel %vm83_vm2, %v77_v19, -inf  ;;  %v119_v21 = vsel %vm117_vm3, %v77_v19, 0.0 }
  0x9b   :  { %88 = vmax.xlane.f32.xlu0 %v87_v20  ;;  %v123_v22 = vsel %vm83_vm2, %v119_v21, 0.0 }
  0x9c   :  { %124 = vadd.xlane.f32.xlu1 %v123_v22 }
  0xa3   :  { %121 = vadd.xlane.f32.xlu0 %v120_v24 }
 0x106   :  { %v86_v25 = vpop.xlane.xlu0 %85 }
 0x107   :  { %v90_v26 = vsub.f32 %v75_v13, %v86_v25 }
 0x109   :  { %v92_v27 = vmul.f32 1.442695, %v90_v26 }
 0x10b   :  { %174 = vpow2.f32 %v92_v27 }
 0x10e   :  { %v89_v28 = vpop.xlane.xlu0 %88 }
 0x10f   :  { %v91_v29 = vsub.f32 %v77_v19, %v89_v28  ;;  %v125_v46 = vpop.xlane.xlu1 %124 }
 0x111   :  { %v175_v30 = vpop.eup %174  ;;  %v94_v31 = vmul.f32 1.442695, %v91_v29 }
 0x112   :  { %v96_v32 = vsel %vm83_vm2, %v175_v30, 0.0 }
 0x113   :  { %176 = vpow2.f32 %v94_v31  ;;  %97 = vadd.xlane.f32.xlu2 %v96_v32 }
 0x116   :  { %v122_v41 = vpop.xlane.xlu0 %121 }
 0x119   :  { %v177_v33 = vpop.eup %176 }
 0x11a   :  { %v99_v34 = vsel %vm83_vm2, %v177_v33, 0.0 }
 0x11b   :  { %100 = vadd.xlane.f32.xlu2 %v99_v34 }
 0x186   :  { %v98_v35 = vpop.xlane.xlu2 %97 }
 0x187   :  { %178 = vlog2.f32 %v98_v35 }
 0x18d   :  { %v179_v36 = vpop.eup %178 }
 0x18e   :  { %v103_v37 = vmul.f32 0.6931472, %v179_v36  ;;  %v101_v38 = vpop.xlane.xlu2 %100 }
 0x18f   :  { %180 = vlog2.f32 %v101_v38 }
 0x190   :  { %v106_v39 = vadd.f32 %v103_v37, %v86_v25 }
 0x192   :  { %v127_v42 = vsub.f32 %v106_v39, %v122_v41 }
 0x194   :  { %v129_v49 = vmul.f32 %v127_v42, %v81_v44 }
 0x195   :  { %v181_v40 = vpop.eup %180 }
 0x196   :  { %v105_v43 = vmul.f32 0.6931472, %v181_v40  ;;  %v132_v51 = vsel %vm131_vm5, %v129_v49, 0.0 }
 0x198   :  { %v107_v45 = vadd.f32 %v105_v43, %v89_v28 }
 0x19a   :  { %v128_v48 = vsub.f32 %v107_v45, %v125_v46 }
 0x19c   :  { %v130_v50 = vmul.f32 %v128_v48, %v82_v47 }
 0x19e   :  { %v133_v52 = vsel %vm131_vm5, %v130_v50, 0.0 }
 0x19f   :  { %v134_v53 = vadd.f32 %v133_v52, %v132_v51 }
 0x1a1   :  { %135 = vadd.xlane.f32.xlu2 %v134_v53 }
 0x214   :  { %v136_v55 = vpop.xlane.xlu2 %135 }
 0x215   :  { %v137_v56 = vrot.slane %v136_v55, 4 }
 0x217   :  { %v138_v57 = vadd.f32 %v137_v56, %v136_v55 }
 0x219   :  { %v139_v58 = vrot.slane %v138_v57, 2 }
 0x21b   :  { %v140_v59 = vadd.f32 %v139_v58, %v138_v57 }
 0x21d   :  { %v141_v60 = vrot.slane %v140_v59, 1 }
 0x21f   :  { %v142_v61 = vadd.f32 %v141_v60, %v140_v59 }
 0x221   :  { %167 = vpush %v142_v61 }
 0x252   :  { %s168_s10 = spop %167 }
 0x253   :  { %v144_v63 = vstv %s168_s10 }
 0x254   :  { %v145_v0 = vadd.f32 %v144_v63, %v126_v62 }
 0x256   :  { %146 = vst [vmem:[%s261_s5] sm:$0x1] %v145_v0 }

// kernel: forward_train.8
= control target key start
LH: loop header
LB: loop body
LE: loop exit
PB: predicated region body
PF: predicated region fallthrough
CT: control target
= control target key end

     0   :  { %vm50_vm0 = vcmask 392192   ;;  %vm68_vm1 = vcmask 261120   ;;  %s138_s1 = inlined_call_operand.vmem [shape: bf16[48,32], index: 1, kind: input, shape index: {}]   ;;  %s139_s2 = inlined_call_operand.vmem [shape: f32[1,32], index: 2, kind: input, shape index: {}]   ;;  %s140_s0 = inlined_call_operand.vmem [shape: bf16[16,48], index: 0, kind: input, shape index: {}]   ;;  %s141_s3 = inlined_call_operand.vmem [shape: f32[16,32], index: 3, kind: output, shape index: {}]  }
   0x1   :  { %v95_v0 = vld [vmem:[%s138_s1 + $0x10] sm:$0xff]  ;;  %v94_v1 = vld [vmem:[%s138_s1 + $0x8] sm:$0xff]  ;;  %v93_v2 = vld [vmem:[%s138_s1] sm:$0xff] }
   0x2   :  { %59 = vmatpush.bf16.msra.mxu0 %v95_v0  ;;  %v92_v3 = vld [vmem:[%s140_s0] sm:$0xff] }
   0x3   :  { %v96_v4 = vld [vmem:[%s139_s2] ss:$0 sm:$0xff] }
   0x6   :  { %60 = vmatpush.bf16.msra.mxu0 %v94_v1 }
   0xa   :  { %61 = vmatpush.bf16.msra.mxu0 %v93_v2 }
   0xd   :  { %91 = vmatmul.msk.bf16.vlgmr.msra.gmra.mxu0 %vm50_vm0, %v92_v3 }
  0x8a   :  { %v63_v5 = vpop.f32.mrf.mxu0 }
  0x8b   :  { %v64_v6 = vadd.f32 %v96_v4, %v63_v5 }
  0x8d   :  { %69 = vst.msk [vmem:[%s141_s3] sm:$0xff] %vm68_vm1, %v64_v6 }
  0x92   :  { %v65_v7 = vpop.f32.mrf.mxu0 }
  0x93   :  { %v66_v8 = vadd.f32 %v96_v4, %v65_v7 }
  0x95   :  { %70 = vst.msk [vmem:[%s141_s3 + $0x8] sm:$0xff] %vm68_vm1, %v66_v8 }

// kernel: forward_train.9
= control target key start
LH: loop header
LB: loop body
LE: loop exit
PB: predicated region body
PF: predicated region fallthrough
CT: control target
= control target key end

     0   :  { %s2039_s0 = inlined_call_operand.vmem [shape: f32[2,8,16], index: 0, kind: input, shape index: {}]   ;;  %s2040_s1 = inlined_call_operand.vmem [shape: f32[2,16,8], index: 1, kind: input, shape index: {}]   ;;  %s2041_s2 = inlined_call_operand.vmem [shape: f32[16,4], index: 2, kind: input, shape index: {}]   ;;  %s2042_s3 = inlined_call_operand.vmem [shape: bf16[2,8,4,8], index: 3, kind: input, shape index: {}]   ;;  %s2043_s4 = inlined_call_operand.vmem [shape: f32[2,8,1], index: 4, kind: input, shape index: {}]   ;;  %s2044_s5 = inlined_call_operand.vmem [shape: f32[2,1,8], index: 5, kind: input, shape index: {}]   ;;  %s2045_s6 = inlined_call_operand.vmem [shape: f32[2,1,128], index: 6, kind: output, shape index: {}]  }
   0x1   :  { %2050 = sst [smem:[#allocation9_spill]] %s2039_s0 }
   0x2   :  { %2051 = sst [smem:[#allocation10_spill]] %s2040_s1 }
   0x3   :  { %2052 = sst [smem:[#allocation11_spill]] %s2041_s2 }
   0x4   :  { %2053 = sst [smem:[#allocation12_spill]] %s2042_s3 }
   0x5   :  { %2054 = sst [smem:[#allocation13_spill]] %s2043_s4 }
   0x6   :  { %2055 = sst [smem:[#allocation14_spill]] %s2044_s5 }
   0x7   :  { %2056 = sst [smem:[#allocation15_spill]] %s2045_s6 }
   0x8   :  { %11 = vsyncpa [#allocation3], 0  ;;  %s1475_s21 = smov 0   ;;  %s1477_s22 = smov 0  }
   0x9   :  { %s1479_s23 = smov 0  }
   0xa LB: > { %2057 = sst [smem:[#allocation5_spill]] %s1414_s22  ;;  %s1168_s24 = sadd.s32 4294967295, %s1418_s23   ;;  %s1418_s23 = sphi %s1479_s23, %s17_s23   ;;  %s1414_s22 = sphi %s1477_s22, %s2074_s22   ;;  %s1410_s21 = sphi %s1475_s21, %s2073_s21  }
   0xb   : > { %2058 = sst [smem:[#allocation6_spill]] %s1418_s23  ;;  %s36_s25 = sadd.s32 1, %s1414_s22 }
   0xc   : > { %p38_p0 = scmp.ge.s32.totalorder %s36_s25, 2  ;;  %p1170_p1 = scmp.ge.s32.totalorder %s1418_s23, 1 }
   0xd   : > { %p230_p2 = scmp.lt.s32.totalorder %s1418_s23, 3  ;;  %p1264_p4 = scmp.eq.s32.totalorder %s1168_s24, 0 }
   0xe   : > { %s2076_s25 = smov (%p38_p0, %s36_s25), 0  ;;  %s2060_s2 = sld [smem:[#allocation11_spill]] }
   0xf   : > { %2059 = sst [smem:[#allocation7_spill]] %s2076_s25  ;;  %p231_p3 = pnand %p1170_p1, %p230_p2 }
  0x10   : > { %s1420_s29 = smov [#allocation2]   ;;  %s1421_s30 = smov 128  }
  0x11   : > { %p1260_p5 = pneg %p231_p3  ;;  %s1422_s7 = smov 8  }
  0x12   : > { %313 = sbr.rel (%p231_p3) target bundleno = 444 (0x1bc), region = 44 }
  0x13   : > { %p1261_p6 = pnand %p1264_p4, %p1260_p5 }
  0x14   : > { %s241_s28 = sshll.u32 %s2060_s2, 4  ;;  %s242_s28 = int_to_ptr.vmem [resolvable:$true] %s241_s28 }
  0x15   : > { %1263 = dma.vmem_to_smem (!%p1261_p6), %s242_s28, 256, %s1420_s29, [#allocation3], %s1421_s30, %s1421_s30, %s1422_s7  }
  0x17   : > { %1405 = dma.done.wait (%p1264_p4), [#allocation3], 256  }
  0x18   : > { %1407 = vsyncadd (%p1264_p4), [#allocation3], 4294967040 }
  0x19   : > { %320 = sfence }
  0x1a   : > { %p378_p7 = scmp.lt.s32.totalorder %s1410_s21, 1  ;;  %v1423_v0 = vmov 2   ;;  %v1424_v1 = vmov 0   ;;  %v1425_v2 = vmov 4   ;;  %s2061_s0 = sld [smem:[#allocation9_spill]]  ;;  %v1426_v4 = vmov 3  }
  0x1b   : > { %1312 = vset.pattern.permute.xlu1 %v1423_v0  ;;  %1310 = vset.pattern.permute.xlu0 %v1424_v1  ;;  %v1427_v5 = vmov 1   ;;  %v1428_v6 = vmov 5   ;;  %v1429_v7 = vmov 6   ;;  %v1430_v8 = vmov 8   ;;  %s2063_s4 = sld [smem:[#allocation13_spill]] }
  0x1c   : > { %s2078_s21 = smov (!%p378_p7, %s1410_s21), 1  ;;  %1314 = vset.pattern.permute.xlu2 %v1425_v2  ;;  %v1431_v9 = vmov 7   ;;  %v1432_v10 = vmov 9   ;;  %v1433_v11 = vmov 13   ;;  %v1434_v12 = vmov 10   ;;  %s1514_s18 = sld [smem:[#allocation2 + $0x100]] }
  0x1d   : > { %s1175_s8 = sshll.u32 %s2078_s21, 3  ;;  %v1435_v13 = vmov 11   ;;  %v1436_v14 = vmov 15   ;;  %v1437_v15 = vmov 12   ;;  %v1438_v16 = vmov 14   ;;  %s1516_s19 = sld [smem:[#allocation2 + $0x101]] }
  0x1e   : > { %s1518_s20 = sld [smem:[#allocation2 + $0x102]]  ;;  %s2046_s30 = sshll.u32 %s2078_s21, 4  ;;  %vm845_vm0 = vcmask 1041409   ;;  %vm847_vm1 = vcmask 1042434   ;;  %vm849_vm2 = vcmask 1043459   ;;  %vm851_vm3 = vcmask 1044484  }
  0x1f   : > { %s1520_s24 = sld [smem:[#allocation2 + $0x103]]  ;;  %vm853_vm4 = vcmask 1045509   ;;  %vm855_vm5 = vcmask 1046534   ;;  %vm857_vm6 = vcmask 1047559   ;;  %vm877_vm9 = vcmask 64512  }
  0x20   : > { %s384_s11 = scalar_lea.vmem %s2061_s0, %s1175_s8  ;;  %s1522_s26 = sld [smem:[#allocation2]] }
  0x21   : > { %v429_v3 = vld [vmem:[%s384_s11] sm:$0xff]  ;;  %s412_s17 = scalar_lea.vmem %s2063_s4, %s1175_s8  ;;  %s1524_s27 = sld [smem:[#allocation2 + $0x1]] }
  0x22   : > { %507 = vperm.xlu1 %1312, %v429_v3   ;;  %461 = vperm.xlu0 %1310, %v429_v3   ;;  %v448_v17 = vld [vmem:[%s412_s17] sm:$0xff]  ;;  %s1526_s28 = sld [smem:[#allocation2 + $0x2]]  ;;  %v514_v29 = vstv %s1514_s18 }
  0x23   : > { %553 = vperm.xlu2 %1314, %v429_v3   ;;  %s1528_s29 = sld [smem:[#allocation2 + $0x3]]  ;;  %v518_v30 = vstv %s1516_s19 }
  0x24   : > { %s1531_s7 = sld [smem:[#allocation2 + $0x200]]  ;;  %v522_v31 = vstv %s1518_s20 }
  0x25   : > { %2064 = sst [smem:[#allocation8_spill]] %s1520_s24  ;;  %v526_v34 = vstv %s1520_s24 }
  0x26   : > { %s1533_s8 = sld [smem:[#allocation2 + $0x201]]  ;;  %v468_v35 = vstv %s1522_s26  ;;  %s2067_s26 = sshll.u32 %s2078_s21, 4 }
  0x27   : > { %s1535_s9 = sld [smem:[#allocation2 + $0x202]]  ;;  %v472_v37 = vstv %s1524_s27 }
  0x28   : > { %s2065_s1 = sld [smem:[#allocation10_spill]]  ;;  %v476_v38 = vstv %s1526_s28 }
  0x29   : > { %s1544_s13 = sld [smem:[#allocation2 + $0x203]]  ;;  %v480_v39 = vstv %s1528_s29 }
  0x2a   : > { %1313 = vset.pattern.permute.xlu1 %v1426_v4  ;;  %1311 = vset.pattern.permute.xlu0 %v1427_v5  ;;  %s1546_s15 = sld [smem:[#allocation2 + $0x180]]  ;;  %v560_v40 = vstv %s1531_s7 }
  0x2b   : > { %530 = vperm.xlu1 %1313, %v429_v3   ;;  %484 = vperm.xlu0 %1311, %v429_v3   ;;  %s1548_s16 = sld [smem:[#allocation2 + $0x181]] }
  0x2c   : > { %1315 = vset.pattern.permute.xlu2 %v1428_v6  ;;  %s1553_s17 = sld [smem:[#allocation2 + $0x182]]  ;;  %v564_v42 = vstv %s1533_s8 }
  0x2d   : > { %576 = vperm.xlu2 %1315, %v429_v3   ;;  %s1556_s14 = sld [smem:[#allocation2 + $0x183]]  ;;  %v568_v43 = vstv %s1535_s9 }
  0x2e   : > { %s1542_s12 = scalar_lea.vmem %s2065_s1, %s2046_s30  ;;  %s1558_s0 = sld [smem:[#allocation2 + $0x80]] }
  0x2f   : > { %v1551_v20 = vld [vmem:[%s1542_s12] sm:$0xff]  ;;  %s1560_s10 = sld [smem:[#allocation2 + $0x81]]  ;;  %v572_v45 = vstv %s1544_s13  ;;  %v1623_v63 = vld [vmem:[%s1542_s12 + $0x8] sm:$0xff] }
  0x30   : > { %v556_v21 = vperm.slane %v1551_v20, 4  ;;  %s1562_s11 = sld [smem:[#allocation2 + $0x82]]  ;;  %v579_v24 = vperm.slane %v1551_v20, 5  ;;  %v464_v27 = vperm.slane %v1551_v20, 0  ;;  %v625_v32 = vperm.slane %v1551_v20, 7 }
  0x31   : > { %s1564_s30 = sld [smem:[#allocation2 + $0x83]]  ;;  %v510_v33 = vperm.slane %v1551_v20, 2  ;;  %v533_v36 = vperm.slane %v1551_v20, 3  ;;  %v537_v46 = vstv %s1546_s15  ;;  %v487_v47 = vperm.slane %v1551_v20, 1 }
  0x32   : > { %s1567_s1 = sld [smem:[#allocation2 + $0x280]]  ;;  %v541_v50 = vstv %s1548_s16  ;;  %v545_v51 = vstv %s1553_s17  ;;  %v602_v6 = vperm.slane %v1551_v20, 6 }
  0x33   : > { %1316 = vset.pattern.permute.xlu1 %v1429_v7  ;;  %1318 = vset.pattern.permute.xlu0 %v1430_v8  ;;  %s1569_s2 = sld [smem:[#allocation2 + $0x281]]  ;;  %v549_v52 = vstv %s1556_s14  ;;  %v694_v7 = vperm.slane %v1623_v63, 2 }
  0x34   : > { %599 = vperm.xlu1 %1316, %v429_v3   ;;  %645 = vperm.xlu0 %1318, %v429_v3   ;;  %s1571_s4 = sld [smem:[#allocation2 + $0x282]]  ;;  %v491_v54 = vstv %s1558_s0 }
  0x35   : > { %1317 = vset.pattern.permute.xlu2 %v1431_v9  ;;  %s1573_s25 = sld [smem:[#allocation2 + $0x283]]  ;;  %v495_v57 = vstv %s1560_s10 }
  0x36   : > { %622 = vperm.xlu2 %1317, %v429_v3   ;;  %s1576_s22 = sld [smem:[#allocation2 + $0x300]]  ;;  %v499_v58 = vstv %s1562_s11 }
  0x37   : > { %s1581_s23 = sld [smem:[#allocation2 + $0x301]]  ;;  %v503_v59 = vstv %s1564_s30 }
  0x38   : > { %s1588_s6 = sld [smem:[#allocation2 + $0x302]]  ;;  %v583_v4 = vstv %s1567_s1 }
  0x39   : > { %s1594_s5 = sld [smem:[#allocation2 + $0x303]]  ;;  %v587_v5 = vstv %s1569_s2 }
  0x3a   : > { %s1598_s3 = sld [smem:[#allocation2 + $0x380]]  ;;  %v591_v8 = vstv %s1571_s4 }
  0x3b   : > { %s1603_s24 = sld [smem:[#allocation2 + $0x381]]  ;;  %v595_v9 = vstv %s1573_s25 }
  0x3c   : > { %1319 = vset.pattern.permute.xlu1 %v1432_v10  ;;  %1323 = vset.pattern.permute.xlu0 %v1433_v11  ;;  %s1609_s7 = sld [smem:[#allocation2 + $0x382]]  ;;  %v648_v10 = vperm.slane %v1623_v63, 0  ;;  %v606_v11 = vstv %s1576_s22 }
  0x3d   : > { %668 = vperm.xlu1 %1319, %v429_v3   ;;  %760 = vperm.xlu0 %1323, %v429_v3   ;;  %s1614_s8 = sld [smem:[#allocation2 + $0x383]] }
  0x3e   : > { %1320 = vset.pattern.permute.xlu2 %v1434_v12  ;;  %s1625_s9 = sld [smem:[#allocation2 + $0x402]]  ;;  %v610_v12 = vstv %s1581_s23 }
  0x3f   : > { %691 = vperm.xlu2 %1320, %v429_v3   ;;  %s1633_s12 = sld [smem:[#allocation2 + $0x482]] }
  0x40   : > { %s1651_s1 = sld [smem:[#allocation2 + $0x502]] }
  0x41   : > { %s1660_s2 = sld [smem:[#allocation2 + $0x401]] }
  0x42   : > { %s1675_s4 = sld [smem:[#allocation2 + $0x501]] }
  0x43   : > { %s1685_s25 = sld [smem:[#allocation2 + $0x582]] }
  0x44   : > { %s1695_s0 = sld [smem:[#allocation2 + $0x602]] }
  0x45   : > { %1321 = vset.pattern.permute.xlu1 %v1435_v13  ;;  %1327 = vset.pattern.permute.xlu0 %v1436_v14  ;;  %v671_v13 = vperm.slane %v1623_v63, 1  ;;  %s1708_s20 = sld [smem:[#allocation2 + $0x682]] }
  0x46   : > { %714 = vperm.xlu1 %1321, %v429_v3   ;;  %s2068_s29 = sld [smem:[#allocation12_spill]] }
  0x47   : > { %1322 = vset.pattern.permute.xlu2 %v1437_v15  ;;  %v614_v15 = vstv %s1588_s6  ;;  %s1741_s18 = sld [smem:[#allocation2 + $0x782]] }
  0x48   : > { %737 = vperm.xlu2 %1322, %v429_v3   ;;  %s1746_s13 = sld [smem:[#allocation2 + $0x702]] }
  0x49   : > { %s1757_s6 = sld [smem:[#allocation2 + $0x581]] }
  0x4a   : > { %s1781_s14 = sld [smem:[#allocation2 + $0x601]] }
  0x4b   : > { %s1810_s23 = sld [smem:[#allocation2 + $0x681]] }
  0x4c   : > { %s1719_s30 = scalar_lea.vmem %s2068_s29, %s2067_s26  ;;  %s1820_s15 = sld [smem:[#allocation2 + $0x781]] }
  0x4d   : > { %s1824_s16 = sld [smem:[#allocation2 + $0x480]] }
  0x4e   : > { %1324 = vset.pattern.permute.xlu1 %v1438_v16  ;;  %v618_v16 = vstv %s1594_s5  ;;  %s1835_s17 = sld [smem:[#allocation2 + $0x701]] }
  0x4f   : > { %783 = vperm.xlu1 %1324, %v429_v3   ;;  %s1845_s22 = sld [smem:[#allocation2 + $0x500]] }
  0x50   : > { %1325 = vset.pattern.permute.xlu2 %v1436_v14  ;;  %s1851_s5 = sld [smem:[#allocation2 + $0x580]] }
  0x51   : > { %806 = vperm.xlu2 %1325, %v429_v3   ;;  %s1864_s10 = sld [smem:[#allocation2 + $0x600]] }
  0x52   : > { %s1872_s11 = sld [smem:[#allocation2 + $0x680]] }
  0x53   : > { %s2071_s29 = sld [smem:[#allocation15_spill]] }
  0x57   : > { %1326 = vset.pattern.permute.xlu1 %v1424_v1 }
  0x58   : > { %452 = vperm.xlu1 %1326, %v448_v17  }
  0x7d   : > { %v554_v18 = vpop.permute.xlu2 %553 }
  0x7e   : > { %v557_v22 = vadd.f32 %v556_v21, %v554_v18 }
  0x80   : > { %1329 = vtanh.f32 %v557_v22 }
  0x86   : > { %v1330_v44 = vpop.eup %1329 }
  0x87   : > { %v577_v19 = vpop.permute.xlu2 %576  ;;  %v1616_v60 = vmul.f32 %v1330_v44, %v560_v40  ;;  %v1618_v61 = vmul.f32 %v1330_v44, %v564_v42  ;;  %v1620_v62 = vmul.f32 %v1330_v44, %v568_v43  ;;  %v1627_v0 = vmul.f32 %v1330_v44, %v572_v45 }
  0x88   : > { %v580_v28 = vadd.f32 %v579_v24, %v577_v19  ;;  %v629_v24 = vstv %s1598_s3  ;;  %v660_v40 = vstv %s1625_s9  ;;  %v763_v45 = vperm.slane %v1623_v63, 5  ;;  %s1668_s3 = sld [smem:[#allocation2 + $0x481]] }
  0x89   : > { %s1908_s9 = sld [smem:[#allocation2 + $0x403]] }
  0x8a   : > { %1331 = vtanh.f32 %v580_v28 }
  0x90   : > { %v623_v23 = vpop.permute.xlu2 %622  ;;  %v1332_v3 = vpop.eup %1331 }
  0x91   : > { %v626_v48 = vadd.f32 %v625_v32, %v623_v23  ;;  %v1641_v14 = vmul.f32 %v1332_v3, %v583_v4  ;;  %v1645_v18 = vmul.f32 %v1332_v3, %v587_v5  ;;  %v1647_v19 = vmul.f32 %v1332_v3, %v591_v8 }
  0x92   : > { %v1649_v20 = vmul.f32 %v1332_v3, %v595_v9 }
  0x94   : > { %v508_v25 = vpop.permute.xlu1 %507  ;;  %v462_v26 = vpop.permute.xlu0 %461 }
  0x95   : > { %v465_v41 = vadd.f32 %v464_v27, %v462_v26  ;;  %v511_v56 = vadd.f32 %v510_v33, %v508_v25  ;;  %v633_v25 = vstv %s1603_s24  ;;  %v637_v26 = vstv %s1609_s7  ;;  %s1704_s24 = sld [smem:[#allocation2 + $0x400]] }
  0x96   : > { %v641_v27 = vstv %s1614_s8  ;;  %v717_v33 = vperm.slane %v1623_v63, 3  ;;  %s1882_s7 = sld [smem:[#allocation2 + $0x700]] }
  0x97   : > { %1333 = vtanh.f32 %v465_v41  ;;  %s1892_s8 = sld [smem:[#allocation2 + $0x780]] }
  0x98   : > { %1335 = vtanh.f32 %v626_v48 }
  0x99   : > { %v692_v49 = vpop.permute.xlu2 %691  ;;  %1337 = vtanh.f32 %v511_v56 }
  0x9a   : > { %v695_v21 = vadd.f32 %v694_v7, %v692_v49 }
  0x9d   : > { %v531_v53 = vpop.permute.xlu1 %530  ;;  %v485_v55 = vpop.permute.xlu0 %484 }
  0x9e   : > { %v534_v1 = vadd.f32 %v533_v36, %v531_v53  ;;  %v488_v2 = vadd.f32 %v487_v47, %v485_v55  ;;  %v1334_v17 = vpop.eup %1333  ;;  %v740_v36 = vperm.slane %v1623_v63, 4  ;;  %v786_v47 = vperm.slane %v1623_v63, 6 }
  0x9f   : > { %v1336_v22 = vpop.eup %1335  ;;  %v473_v42 = vmul.f32 %v1334_v17, %v472_v37  ;;  %v477_v43 = vmul.f32 %v1334_v17, %v476_v38  ;;  %v683_v37 = vstv %s1633_s12  ;;  %v469_v55 = vmul.f32 %v1334_v17, %v468_v35  ;;  %s1913_s12 = sld [smem:[#allocation2 + $0x483]] }
  0xa0   : > { %1339 = vtanh.f32 %v488_v2  ;;  %v1338_v41 = vpop.eup %1337  ;;  %v1670_v49 = vmul.f32 %v1336_v22, %v629_v24  ;;  %v1672_v53 = vmul.f32 %v1336_v22, %v633_v25  ;;  %v481_v3 = vmul.f32 %v1334_v17, %v480_v39 }
  0xa1   : > { %1341 = vtanh.f32 %v534_v1  ;;  %v523_v35 = vmul.f32 %v1338_v41, %v522_v31  ;;  %v1701_v39 = vmul.f32 %v1336_v22, %v641_v27 }
  0xa2   : > { %v738_v28 = vpop.permute.xlu2 %737  ;;  %1343 = vtanh.f32 %v695_v21  ;;  %v809_v21 = vperm.slane %v1623_v63, 7 }
  0xa3   : > { %v741_v25 = vadd.f32 %v740_v36, %v738_v28 }
  0xa6   : > { %v600_v23 = vpop.permute.xlu1 %599  ;;  %v646_v44 = vpop.permute.xlu0 %645 }
  0xa7   : > { %v603_v32 = vadd.f32 %v602_v6, %v600_v23  ;;  %v1340_v48 = vpop.eup %1339  ;;  %v649_v5 = vadd.f32 %v648_v10, %v646_v44  ;;  %v519_v6 = vmul.f32 %v1338_v41, %v518_v30  ;;  %v702_v44 = vstv %s1675_s4  ;;  %s1944_s4 = sld [smem:[#allocation2 + $0x683]] }
  0xa8   : > { %v1342_v38 = vpop.eup %1341  ;;  %v492_v56 = vmul.f32 %v1340_v48, %v491_v54  ;;  %v496_v1 = vmul.f32 %v1340_v48, %v495_v57  ;;  %v500_v2 = vmul.f32 %v1340_v48, %v499_v58  ;;  %v504_v4 = vmul.f32 %v1340_v48, %v503_v59 }
  0xa9   : > { %1345 = vtanh.f32 %v603_v32  ;;  %v542_v57 = vmul.f32 %v1342_v38, %v541_v50  ;;  %v1699_v58 = vmul.f32 %v1336_v22, %v637_v26  ;;  %v706_v59 = vstv %s1651_s1  ;;  %v1710_v10 = vpop.eup %1343  ;;  %s1922_s1 = sld [smem:[#allocation2 + $0x503]] }
  0xaa   : > { %v497_v7 = vadd.f32 %v496_v1, %v473_v42  ;;  %v501_v54 = vadd.f32 %v500_v2, %v477_v43  ;;  %v546_v30 = vmul.f32 %v1342_v38, %v545_v51  ;;  %v493_v8 = vadd.f32 %v492_v56, %v469_v55 }
  0xab   : > { %v505_v50 = vadd.f32 %v504_v4, %v481_v3  ;;  %1347 = vtanh.f32 %v649_v5  ;;  %v656_v22 = vstv %s1660_s2  ;;  %v515_v51 = vmul.f32 %v1338_v41, %v514_v29  ;;  %v807_v26 = vpop.permute.xlu2 %806  ;;  %v433_v4 = vld [vmem:[%s1719_s30 + $0x2] sm:$0x3]  ;;  %s1931_s2 = sld [smem:[#allocation2 + $0x583]] }
  0xac   : > { %v520_v31 = vadd.f32 %v519_v6, %v497_v7  ;;  %v524_v9 = vadd.f32 %v523_v35, %v501_v54  ;;  %v527_v32 = vmul.f32 %v1338_v41, %v526_v34  ;;  %v679_v43 = vstv %s1668_s3  ;;  %v432_v41 = vld [vmem:[%s1719_s30] sm:$0x3]  ;;  %v434_v6 = vld [vmem:[%s1719_s30 + $0x4] sm:$0x3]  ;;  %v435_v35 = vld [vmem:[%s1719_s30 + $0x6] sm:$0x3] }
  0xad   : > { %v516_v48 = vadd.f32 %v515_v51, %v493_v8  ;;  %v1733_v55 = vmul.f32 %v1710_v10, %v706_v59  ;;  %v729_v56 = vstv %s1685_s25  ;;  %1349 = vtanh.f32 %v741_v25  ;;  %v436_v7 = vld [vmem:[%s1719_s30 + $0x8] sm:$0x3]  ;;  %v437_v8 = vld [vmem:[%s1719_s30 + $0xa] sm:$0x3]  ;;  %s1940_s3 = sld [smem:[#allocation2 + $0x603]] }
  0xae   : > { %v543_v23 = vadd.f32 %v542_v57, %v520_v31  ;;  %v547_v24 = vadd.f32 %v546_v30, %v524_v9  ;;  %v528_v28 = vadd.f32 %v527_v32, %v505_v50  ;;  %v550_v2 = vmul.f32 %v1342_v38, %v549_v52  ;;  %v438_v31 = vld [vmem:[%s1719_s30 + $0xc] sm:$0x3]  ;;  %v439_v9 = vld [vmem:[%s1719_s30 + $0xe] sm:$0x3]  ;;  %s1951_s25 = sld [smem:[#allocation2 + $0x703]]  ;;  %s421_s30 = scalar_lea.vmem %s2071_s29, %s2078_s21 }
  0xaf   : > { %v669_v17 = vpop.permute.xlu1 %668  ;;  %v1723_v27 = vpop.eup %1345  ;;  %v1763_v54 = vunpack.c.l.bf16 %v432_v41  ;;  %v775_v52 = vstv %s1708_s20  ;;  %v1798_v32 = vunpack.c.l.bf16 %v439_v9  ;;  %s2069_s20 = sld [smem:[#allocation14_spill]] }
  0xb0   : > { %v672_v42 = vadd.f32 %v671_v13, %v669_v17  ;;  %v570_v29 = vadd.f32 %v1620_v62, %v547_v24  ;;  %v566_v36 = vadd.f32 %v1618_v61, %v543_v23  ;;  %v615_v34 = vmul.f32 %v1723_v27, %v614_v15  ;;  %v761_v3 = vpop.permute.xlu0 %760 }
  0xb1   : > { %v810_v13 = vadd.f32 %v809_v21, %v807_v26  ;;  %v538_v62 = vmul.f32 %v1342_v38, %v537_v46  ;;  %v1749_v61 = vmul.f32 %v1710_v10, %v702_v44  ;;  %v1751_v15 = vpop.eup %1347  ;;  %v752_v46 = vstv %s1695_s0  ;;  %s1963_s0 = sld [smem:[#allocation2 + $0x783]] }
  0xb2   : > { %v593_v1 = vadd.f32 %v1647_v19, %v570_v29  ;;  %1351 = vtanh.f32 %v672_v42  ;;  %v652_v19 = vstv %s1704_s24  ;;  %v551_v38 = vadd.f32 %v550_v2, %v528_v28 }
  0xb3   : > { %v539_v5 = vadd.f32 %v538_v62, %v516_v48  ;;  %v589_v59 = vadd.f32 %v1645_v18, %v566_v36  ;;  %v611_v30 = vmul.f32 %v1723_v27, %v610_v12  ;;  %1353 = vtanh.f32 %v810_v13  ;;  %v1791_v25 = vpop.eup %1349 }
  0xb4   : > { %v616_v57 = vadd.f32 %v615_v34, %v593_v1  ;;  %v764_v17 = vadd.f32 %v763_v45, %v761_v3  ;;  %v1775_v21 = vunpack.c.l.bf16 %v433_v4  ;;  %v661_v23 = vmul.f32 %v1751_v15, %v660_v40 }
  0xb5   : > { %v1785_v18 = vunpack.c.l.bf16 %v434_v6  ;;  %v1787_v24 = vunpack.c.l.bf16 %v435_v35  ;;  %v1789_v45 = vunpack.c.l.bf16 %v436_v7  ;;  %v1794_v26 = vunpack.c.l.bf16 %v437_v8  ;;  %s2070_s26 = scalar_lea.vmem %s2069_s20, %s2078_s21 }
  0xb6   : > { %v639_v51 = vadd.f32 %v1699_v58, %v616_v57  ;;  %v562_v58 = vadd.f32 %v1616_v60, %v539_v5  ;;  %v1796_v40 = vunpack.c.l.bf16 %v438_v31  ;;  %v574_v42 = vadd.f32 %v1627_v0, %v551_v38 }
  0xb7   : > { %v821_v44 = vstv %s1741_s18  ;;  %v612_v48 = vadd.f32 %v611_v30, %v589_v59  ;;  %v657_v28 = vmul.f32 %v1751_v15, %v656_v22  ;;  %v935_v0 = vperm.slane %v1763_v54, 2 }
  0xb8   : > { %v715_v50 = vpop.permute.xlu1 %714  ;;  %v662_v29 = vadd.f32 %v661_v23, %v639_v51  ;;  %v936_v34 = vperm.slane %v1775_v21, 2  ;;  %v753_v22 = vmul.f32 %v1791_v25, %v752_v46  ;;  %v798_v62 = vstv %s1746_s13 }
  0xb9   : > { %v718_v12 = vadd.f32 %v717_v33, %v715_v50  ;;  %v1800_v33 = vpop.eup %1351  ;;  %v635_v13 = vadd.f32 %v1672_v53, %v612_v48  ;;  %v607_v1 = vmul.f32 %v1723_v27, %v606_v11  ;;  %v1832_v2 = vmul.f32 %v1723_v27, %v618_v16 }
  0xba   : > { %v684_v60 = vmul.f32 %v1800_v33, %v683_v37  ;;  %v1812_v36 = vpop.eup %1353  ;;  %v680_v41 = vmul.f32 %v1800_v33, %v679_v43  ;;  %v725_v3 = vstv %s1757_s6  ;;  %v585_v43 = vadd.f32 %v1641_v14, %v562_v58 }
  0xbb   : > { %1355 = vtanh.f32 %v718_v12  ;;  %v658_v53 = vadd.f32 %v657_v28, %v635_v13  ;;  %v1839_v4 = vadd.f32 %v1649_v20, %v574_v42  ;;  %v1842_v46 = vmul.f32 %v1812_v36, %v821_v44 }
  0xbc   : > { %1357 = vtanh.f32 %v764_v17  ;;  %v685_v37 = vadd.f32 %v684_v60, %v662_v29  ;;  %v748_v5 = vstv %s1781_s14  ;;  %v937_v27 = vperm.slane %v1785_v18, 2 }
  0xbd   : > { %v943_v6 = vsel %vm845_vm0, %v936_v34, %v935_v0  ;;  %v681_v35 = vadd.f32 %v680_v41, %v658_v53  ;;  %v749_v30 = vmul.f32 %v1791_v25, %v748_v5  ;;  %v817_v50 = vstv %s1820_s15 }
  0xbe   : > { %v708_v7 = vadd.f32 %v1733_v55, %v685_v37  ;;  %v771_v55 = vstv %s1810_s23  ;;  %v944_v8 = vsel %vm847_vm1, %v937_v27, %v943_v6  ;;  %v653_v17 = vmul.f32 %v1751_v15, %v652_v19 }
  0xbf   : > { %v704_v59 = vadd.f32 %v1749_v61, %v681_v35  ;;  %v608_v61 = vadd.f32 %v607_v1, %v585_v43  ;;  %v675_v51 = vstv %s1824_s16  ;;  %v794_v58 = vstv %s1835_s17 }
  0xc0   : > { %v890_v42 = vperm.slane %v1763_v54, 1  ;;  %v891_v44 = vperm.slane %v1775_v21, 1  ;;  %v676_v48 = vmul.f32 %v1800_v33, %v675_v51  ;;  %v698_v29 = vstv %s1845_s22 }
  0xc1   : > { %v1847_v11 = vpop.eup %1355  ;;  %v784_v16 = vpop.permute.xlu1 %783  ;;  %v939_v19 = vperm.slane %v1789_v45, 2  ;;  %v818_v28 = vmul.f32 %v1812_v36, %v817_v50  ;;  %v721_v0 = vstv %s1851_s5  ;;  %v892_v13 = vperm.slane %v1785_v18, 1 }
  0xc2   : > { %v1853_v14 = vpop.eup %1357  ;;  %v787_v20 = vadd.f32 %v786_v47, %v784_v16  ;;  %v730_v57 = vmul.f32 %v1847_v11, %v729_v56  ;;  %v726_v38 = vmul.f32 %v1847_v11, %v725_v3  ;;  %v938_v47 = vperm.slane %v1787_v24, 2 }
  0xc3   : > { %v776_v56 = vmul.f32 %v1853_v14, %v775_v52  ;;  %v772_v12 = vmul.f32 %v1853_v14, %v771_v55  ;;  %v631_v52 = vadd.f32 %v1670_v49, %v608_v61  ;;  %v699_v37 = vmul.f32 %v1710_v10, %v698_v29 }
  0xc4   : > { %1359 = vtanh.f32 %v787_v20  ;;  %v731_v63 = vadd.f32 %v730_v57, %v708_v7  ;;  %v727_v31 = vadd.f32 %v726_v38, %v704_v59  ;;  %v945_v60 = vsel %vm849_vm2, %v938_v47, %v944_v8 }
  0xc5   : > { %v654_v41 = vadd.f32 %v653_v17, %v631_v52  ;;  %v744_v3 = vstv %s1864_s10  ;;  %v940_v43 = vperm.slane %v1794_v26, 2  ;;  %v898_v5 = vsel %vm845_vm0, %v891_v44, %v890_v42 }
  0xc6   : > { %v754_v9 = vadd.f32 %v753_v22, %v731_v63  ;;  %v750_v23 = vadd.f32 %v749_v30, %v727_v31  ;;  %v722_v27 = vmul.f32 %v1847_v11, %v721_v0  ;;  %v946_v35 = vsel %vm851_vm3, %v939_v19, %v945_v60 }
  0xc7   : > { %v677_v16 = vadd.f32 %v676_v48, %v654_v41  ;;  %v767_v7 = vstv %s1872_s11  ;;  %v893_v57 = vperm.slane %v1787_v24, 1  ;;  %v745_v59 = vmul.f32 %v1791_v25, %v744_v3 }
  0xc8   : > { %v777_v34 = vadd.f32 %v776_v56, %v754_v9  ;;  %v773_v1 = vadd.f32 %v772_v12, %v750_v23  ;;  %v899_v47 = vsel %vm847_vm1, %v892_v13, %v898_v5  ;;  %v790_v55 = vstv %s1882_s7 }
  0xc9   : > { %v700_v38 = vadd.f32 %v699_v37, %v677_v16  ;;  %v942_v56 = vperm.slane %v1798_v32, 2  ;;  %v947_v8 = vsel %vm853_vm4, %v940_v43, %v946_v35  ;;  %v768_v61 = vmul.f32 %v1853_v14, %v767_v7 }
  0xca   : > { %v1894_v49 = vpop.eup %1359  ;;  %v895_v50 = vperm.slane %v1794_v26, 1  ;;  %v813_v17 = vstv %s1892_s8  ;;  %v900_v51 = vsel %vm849_vm2, %v893_v57, %v899_v47  ;;  %v837_v42 = vperm.slane %v1763_v54, 0 }
  0xcb   : > { %v799_v22 = vmul.f32 %v1894_v49, %v798_v62  ;;  %v795_v53 = vmul.f32 %v1894_v49, %v794_v58  ;;  %v941_v62 = vperm.slane %v1796_v40, 2  ;;  %v723_v31 = vadd.f32 %v722_v27, %v700_v38 }
  0xcc   : > { %v791_v58 = vmul.f32 %v1894_v49, %v790_v55  ;;  %v838_v44 = vperm.slane %v1775_v21, 0  ;;  %v620_v48 = vadd.f32 %v1832_v2, %v1839_v4  ;;  %v896_v29 = vperm.slane %v1796_v40, 1 }
  0xcd   : > { %v800_v6 = vadd.f32 %v799_v22, %v777_v34  ;;  %v796_v20 = vadd.f32 %v795_v53, %v773_v1  ;;  %v746_v12 = vadd.f32 %v745_v59, %v723_v31  ;;  %v664_v41 = vstv %s1908_s9 }
  0xce   : > { %v643_v13 = vadd.f32 %v1701_v39, %v620_v48  ;;  %v839_v4 = vperm.slane %v1785_v18, 0  ;;  %v665_v22 = vmul.f32 %v1751_v15, %v664_v41  ;;  %v846_v1 = vsel %vm845_vm0, %v838_v44, %v837_v42 }
  0xcf   : > { %v1916_v30 = vadd.f32 %v1842_v46, %v800_v6  ;;  %v1918_v63 = vadd.f32 %v818_v28, %v796_v20  ;;  %v894_v46 = vperm.slane %v1789_v45, 1  ;;  %v769_v60 = vadd.f32 %v768_v61, %v746_v12 }
  0xd0   : > { %v814_v28 = vmul.f32 %v1812_v36, %v813_v17  ;;  %v687_v53 = vstv %s1913_s12  ;;  %v710_v3 = vstv %s1922_s1  ;;  %v840_v5 = vperm.slane %v1787_v24, 0 }
  0xd1   : > { %v953_v9 = vand.u32 2147483647, %v1916_v30  ;;  %v908_v23 = vand.u32 2147483647, %v1918_v63  ;;  %v901_v34 = vsel %vm851_vm3, %v894_v46, %v900_v51  ;;  %v792_v2 = vadd.f32 %v791_v58, %v769_v60 }
  0xd2   : > { %v902_v43 = vsel %vm853_vm4, %v895_v50, %v901_v34  ;;  %v666_v16 = vadd.f32 %v665_v22, %v643_v13  ;;  %v688_v27 = vmul.f32 %v1800_v33, %v687_v53  ;;  %v711_v15 = vmul.f32 %v1710_v10, %v710_v3 }
  0xd3   : > { %v954_v52 = vsub.f32 0.0, %v953_v9  ;;  %v909_v19 = vsub.f32 0.0, %v908_v23  ;;  %v1957_v39 = vadd.f32 %v814_v28, %v792_v2  ;;  %v733_v6 = vstv %s1931_s2  ;;  %v453_v28 = vpop.permute.xlu1 %452 }
  0xd4   : > { %v948_v35 = vsel %vm855_vm5, %v941_v62, %v947_v8  ;;  %v897_v20 = vperm.slane %v1798_v32, 1  ;;  %v848_v7 = vsel %vm847_vm1, %v839_v4, %v846_v1  ;;  %v903_v38 = vsel %vm855_vm5, %v896_v29, %v902_v43 }
  0xd5   : > { %v955_v0 = vmul.f32 1.442695, %v954_v52  ;;  %v910_v37 = vmul.f32 1.442695, %v909_v19  ;;  %v862_v57 = vand.u32 2147483647, %v1957_v39  ;;  %v689_v59 = vadd.f32 %v688_v27, %v666_v16 }
  0xd6   : > { %v734_v47 = vmul.f32 %v1847_v11, %v733_v6  ;;  %v756_v33 = vstv %s1940_s3  ;;  %v841_v10 = vperm.slane %v1789_v45, 0  ;;  %v779_v31 = vstv %s1944_s4 }
  0xd7   : > { %1361 = vpow2.f32 %v955_v0  ;;  %v863_v55 = vsub.f32 0.0, %v862_v57  ;;  %v949_v62 = vsel %vm857_vm6, %v942_v56, %v948_v35  ;;  %v850_v8 = vsel %vm849_vm2, %v840_v5, %v848_v7 }
  0xd8   : > { %1363 = vpow2.f32 %v910_v37  ;;  %v712_v9 = vadd.f32 %v711_v15, %v689_v59  ;;  %v757_v46 = vmul.f32 %v1791_v25, %v756_v33  ;;  %v904_v51 = vsel %vm857_vm6, %v897_v20, %v903_v38  ;;  %v1328_v25 = vld [vmem:[%s2070_s26] ss:$0 sm:$0xff] }
  0xd9   : > { %v864_v11 = vmul.f32 1.442695, %v863_v55  ;;  %v802_v23 = vstv %s1951_s25  ;;  %v780_v42 = vmul.f32 %v1853_v14, %v779_v31  ;;  %v842_v44 = vperm.slane %v1794_v26, 0 }
  0xda   : > { %v735_v52 = vadd.f32 %v734_v47, %v712_v9  ;;  %v852_v48 = vsel %vm851_vm3, %v841_v10, %v850_v8  ;;  %v803_v19 = vmul.f32 %v1894_v49, %v802_v23  ;;  %v825_v60 = vstv %s1963_s0 }
  0xdb   : > { %v934_v0 = vmax.f32 %v1916_v30, 0.0  ;;  %v951_v14 = vmul.f32 %v949_v62, %v1916_v30  ;;  %v843_v34 = vperm.slane %v1796_v40, 0  ;;  %v889_v41 = vmax.f32 %v1918_v63, 0.0 }
  0xdc   : > { %v758_v29 = vadd.f32 %v757_v46, %v735_v52  ;;  %v906_v37 = vmul.f32 %v904_v51, %v1918_v63  ;;  %v854_v1 = vsel %vm853_vm4, %v842_v44, %v852_v48  ;;  %v826_v49 = vmul.f32 %v1812_v36, %v825_v60 }
  0xdd   : > { %v1362_v61 = vpop.eup %1361  ;;  %v1996_v53 = vmul.f32 %v1328_v25, %v453_v28  ;;  %v952_v5 = vsub.f32 %v934_v0, %v951_v14  ;;  %v844_v16 = vperm.slane %v1798_v32, 0  ;;  %v980_v27 = vperm.slane %v1763_v54, 3 }
  0xde   : > { %v1364_v50 = vpop.eup %1363  ;;  %v957_v17 = vadd.f32 1.0, %v1362_v61  ;;  %v960_v12 = vmul.f32 -0.5, %v1362_v61  ;;  %v781_v2 = vadd.f32 %v780_v42, %v758_v29  ;;  %v963_v4 = vand.u32 2147483647, %v1362_v61 }
  0xdf   : > { %v912_v58 = vadd.f32 1.0, %v1364_v50  ;;  %v915_v56 = vmul.f32 -0.5, %v1364_v50  ;;  %v918_v3 = vand.u32 2147483647, %v1364_v50  ;;  %v981_v15 = vperm.slane %v1775_v21, 3 }
  0xe0   : > { %1365 = vlog2.f32 %v957_v17  ;;  %v961_v13 = vadd.f32 1.0, %v960_v12  ;;  %v804_v43 = vadd.f32 %v803_v19, %v781_v2  ;;  %v907_v20 = vsub.f32 %v889_v41, %v906_v37 }
  0xe1   : > { %1367 = vlog2.f32 %v912_v58  ;;  %v916_v22 = vadd.f32 1.0, %v915_v56  ;;  %v856_v7 = vsel %vm855_vm5, %v843_v34, %v854_v1  ;;  %vm964_vm7 = vcmp.lt.f32.partialorder %v963_v4, 0.0004427343 }
  0xe2   : > { %1369 = vpow2.f32 %v864_v11  ;;  %v962_v35 = vmul.f32 %v1362_v61, %v961_v13  ;;  %v827_v59 = vadd.f32 %v826_v49, %v804_v43  ;;  %vm919_vm8 = vcmp.lt.f32.partialorder %v918_v3, 0.0004427343 }
  0xe3   : > { %v917_v38 = vmul.f32 %v1364_v50, %v916_v22  ;;  %v982_v10 = vperm.slane %v1785_v18, 3  ;;  %v988_v21 = vsel %vm845_vm0, %v981_v15, %v980_v27  ;;  %v858_v8 = vsel %vm857_vm6, %v844_v16, %v856_v7 }
  0xe4   : > { %v983_v9 = vperm.slane %v1787_v24, 3  ;;  %v998_v46 = vand.u32 2147483647, %v827_v59  ;;  %v828_v51 = vmax.f32 %v1957_v39, 0.0  ;;  %v860_v58 = vmul.f32 %v858_v8, %v1957_v39 }
  0xe5   : > { %v989_v17 = vsel %vm847_vm1, %v982_v10, %v988_v21  ;;  %v984_v42 = vperm.slane %v1789_v45, 3  ;;  %v985_v29 = vperm.slane %v1794_v26, 3  ;;  %v986_v39 = vperm.slane %v1796_v40, 3 }
  0xe6   : > { %v1366_v30 = vpop.eup %1365  ;;  %v999_v23 = vsub.f32 0.0, %v998_v46  ;;  %v990_v24 = vsel %vm849_vm2, %v983_v9, %v989_v17  ;;  %v861_v19 = vsub.f32 %v828_v51, %v860_v58  ;;  %v987_v13 = vperm.slane %v1798_v32, 3 }
  0xe7   : > { %v1368_v63 = vpop.eup %1367  ;;  %v959_v6 = vmul.f32 0.6931472, %v1366_v30  ;;  %v991_v60 = vsel %vm851_vm3, %v984_v42, %v990_v24  ;;  %v979_v1 = vmax.f32 %v827_v59, 0.0 }
  0xe8   : > { %v1370_v57 = vpop.eup %1369  ;;  %v914_v36 = vmul.f32 0.6931472, %v1368_v63  ;;  %v1000_v56 = vmul.f32 1.442695, %v999_v23  ;;  %v992_v45 = vsel %vm853_vm4, %v985_v29, %v991_v60 }
  0xe9   : > { %v965_v47 = vsel %vm964_vm7, %v962_v35, %v959_v6  ;;  %v866_v33 = vadd.f32 1.0, %v1370_v57  ;;  %v869_v31 = vmul.f32 -0.5, %v1370_v57  ;;  %v872_v52 = vand.u32 2147483647, %v1370_v57 }
  0xea   : > { %v966_v55 = vadd.f32 %v965_v47, %v952_v5  ;;  %v920_v54 = vsel %vm919_vm8, %v917_v38, %v914_v36  ;;  %v993_v26 = vsel %vm855_vm5, %v986_v39, %v992_v45 }
  0xeb   : > { %v921_v61 = vadd.f32 %v920_v54, %v907_v20  ;;  %1371 = vlog2.f32 %v866_v33  ;;  %v870_v11 = vadd.f32 1.0, %v869_v31  ;;  %vm873_vm10 = vcmp.lt.f32.partialorder %v872_v52, 0.0004427343 }
  0xec   : > { %v967_v62 = vmul.f32 %v966_v55, %v1996_v53  ;;  %1373 = vpow2.f32 %v1000_v56  ;;  %v994_v4 = vsel %vm857_vm6, %v987_v13, %v993_v26 }
  0xed   : > { %v922_v50 = vmul.f32 %v921_v61, %v1996_v53  ;;  %v871_v25 = vmul.f32 %v1370_v57, %v870_v11  ;;  %v996_v40 = vmul.f32 %v994_v4, %v827_v59 }
  0xee   : > { %v968_v18 = vsel %vm877_vm9, %v967_v62, 0.0 }
  0xef   : > { %969 = vadd.xlane.f32.xlu1 %v968_v18  ;;  %v923_v12 = vsel %vm877_vm9, %v922_v50, 0.0  ;;  %v997_v5 = vsub.f32 %v979_v1, %v996_v40 }
  0xf0   : > { %924 = vadd.xlane.f32.xlu0 %v923_v12  ;;  %v1439_v12 = vmov 0.0  }
  0xf1   : > { %v1372_v44 = vpop.eup %1371  ;;  %428 = vst [vmem:[%s421_s30] sm:$0x1] %v1439_v12 }
  0xf2   : > { %v868_v48 = vmul.f32 0.6931472, %v1372_v44  ;;  %v1374_v34 = vpop.eup %1373 }
  0xf3   : > { %v1002_v37 = vadd.f32 1.0, %v1374_v34  ;;  %v1005_v2 = vmul.f32 -0.5, %v1374_v34  ;;  %v1008_v49 = vand.u32 2147483647, %v1374_v34 }
  0xf4   : > { %v874_v28 = vsel %vm873_vm10, %v871_v25, %v868_v48 }
  0xf5   : > { %v875_v0 = vadd.f32 %v874_v28, %v861_v19  ;;  %1375 = vlog2.f32 %v1002_v37  ;;  %v1006_v22 = vadd.f32 1.0, %v1005_v2  ;;  %vm1009_vm11 = vcmp.lt.f32.partialorder %v1008_v49, 0.0004427343 }
  0xf7   : > { %v876_v14 = vmul.f32 %v875_v0, %v1996_v53  ;;  %v1007_v30 = vmul.f32 %v1374_v34, %v1006_v22 }
  0xf8   : > { %v1024_v58 = vld [vmem:[%s421_s30] sm:$0x1] }
  0xf9   : > { %v878_v41 = vsel %vm877_vm9, %v876_v14, 0.0 }
  0xfa   : > { %879 = vadd.xlane.f32.xlu2 %v878_v41 }
  0xfb   : > { %v1376_v3 = vpop.eup %1375 }
  0xfc   : > { %v1004_v43 = vmul.f32 0.6931472, %v1376_v3 }
  0xfe   : > { %v1010_v32 = vsel %vm1009_vm11, %v1007_v30, %v1004_v43 }
  0xff   : > { %v1011_v16 = vadd.f32 %v1010_v32, %v997_v5 }
 0x101   : > { %v1012_v27 = vmul.f32 %v1011_v16, %v1996_v53 }
 0x103   : > { %v1013_v15 = vsel %vm877_vm9, %v1012_v27, 0.0 }
 0x104   : > { %1014 = vadd.xlane.f32.xlu2 %v1013_v15 }
 0x162   : > { %v970_v63 = vpop.xlane.xlu1 %969 }
 0x163   : > { %v925_v6 = vpop.xlane.xlu0 %924  ;;  %v971_v35 = vrot.slane %v970_v63, 4 }
 0x164   : > { %v926_v20 = vrot.slane %v925_v6, 4 }
 0x165   : > { %v972_v57 = vadd.f32 %v971_v35, %v970_v63 }
 0x166   : > { %v927_v7 = vadd.f32 %v926_v20, %v925_v6 }
 0x167   : > { %v973_v38 = vrot.slane %v972_v57, 2 }
 0x168   : > { %v928_v36 = vrot.slane %v927_v7, 2 }
 0x169   : > { %v974_v10 = vadd.f32 %v973_v38, %v972_v57 }
 0x16a   : > { %v929_v33 = vadd.f32 %v928_v36, %v927_v7 }
 0x16b   : > { %v975_v53 = vrot.slane %v974_v10, 1 }
 0x16c   : > { %v930_v31 = vrot.slane %v929_v33, 1 }
 0x16d   : > { %v880_v59 = vpop.xlane.xlu2 %879  ;;  %v976_v9 = vadd.f32 %v975_v53, %v974_v10 }
 0x16e   : > { %v881_v47 = vrot.slane %v880_v59, 4  ;;  %v931_v62 = vadd.f32 %v930_v31, %v929_v33 }
 0x170   : > { %v882_v55 = vadd.f32 %v881_v47, %v880_v59 }
 0x172   : > { %v883_v54 = vrot.slane %v882_v55, 2 }
 0x174   : > { %v884_v21 = vadd.f32 %v883_v54, %v882_v55 }
 0x176   : > { %v885_v61 = vrot.slane %v884_v21, 1 }
 0x177   : > { %v1015_v46 = vpop.xlane.xlu2 %1014 }
 0x178   : > { %v886_v8 = vadd.f32 %v885_v61, %v884_v21  ;;  %v1016_v50 = vrot.slane %v1015_v46, 4 }
 0x17a   : > { %1248 = vpush %v886_v8  ;;  %v1017_v17 = vadd.f32 %v1016_v50, %v1015_v46 }
 0x17b   : > { %1250 = vpush %v931_v62 }
 0x17c   : > { %1252 = vpush %v976_v9  ;;  %v1018_v18 = vrot.slane %v1017_v17, 2 }
 0x17e   : > { %v1019_v51 = vadd.f32 %v1018_v18, %v1017_v17 }
 0x180   : > { %v1020_v11 = vrot.slane %v1019_v51, 1 }
 0x182   : > { %v1021_v23 = vadd.f32 %v1020_v11, %v1019_v51 }
 0x184   : > { %1254 = vpush %v1021_v23 }
 0x1ab   : > { %s1249_s18 = spop %1248 }
 0x1ac   : > { %s1251_s13 = spop %1250 }
 0x1ad   : > { %s933_s6 = sadd.f32 %s1251_s13, %s1249_s18  ;;  %s1253_s14 = spop %1252 }
 0x1af   : > { %s978_s23 = sadd.f32 %s1253_s14, %s933_s6 }
 0x1b5   : > { %s1255_s15 = spop %1254 }
 0x1b6   : > { %s1023_s16 = sadd.f32 %s1255_s15, %s978_s23 }
 0x1b8   : > { %v1025_v52 = vstv %s1023_s16 }
 0x1b9   : > { %v1026_v42 = vadd.f32 %v1025_v52, %v1024_v58 }
 0x1bb   : > { %1027 = vst [vmem:[%s421_s30] sm:$0x1] %v1026_v42 }
 0x1bc PF: > { %s2072_s17 = sld [smem:[#allocation6_spill]] }
 0x1bd   : > { %s2073_s21 = sld [smem:[#allocation5_spill]] }
 0x1be   : > { %s2074_s22 = sld [smem:[#allocation7_spill]] }
 0x1c2   : > { %s17_s23 = sadd.s32 1, %s2072_s17  }
 0x1c3   : > { %p14_p8 = scmp.ge.s32.totalorder %s17_s23, 4  }
 0x1c5   :  { %16 = sbr.rel (!%p14_p8) target bundleno = 10 (0xa), region = 95 }
 0x1ca   :  { %1045 = vsyncpa [#allocation3], 1 }
 0x1cb   :  { %1047 = vsyncpa [#allocation3 + $0x1], 1 }

</bundles_post_ra>
